<compile_context>
chip_gen: v7x
topology: tpu7x:2x2x1
jax: 0.10.0
libtpu: 0.0.40
codegen_flags: <defaults>
</compile_context>

<pallas_src>
import jax
import jax.numpy as jnp
from jax import lax
from jax.experimental import pallas as pl
from jax.experimental.pallas import tpu as pltpu

EMBED = 20    # embedding_size in the torch module
LANE = 128
FPAD = 128    # lane-dense feature padding


def _round_up(x, m):
    return ((x + m - 1) // m) * m


def _vmem_capacity_bytes():
    """Physical VMEM of the current chip; conservative (v7x) default on failure."""
    try:
        info = pltpu.get_tpu_info()
        cap = getattr(info, "vmem_capacity_bytes", None)
        if cap:
            return int(cap)
    except Exception:
        pass
    return 64 * 1024 * 1024


def _vmem_limit_bytes(cap):
    # ~96 MiB on 128-MiB chips (v5e/v6e), ~48 MiB on 64-MiB v7x.
    return min(int(0.75 * cap), cap - 8 * 1024 * 1024)


def _choose_tile(n_pad, vmem_limit):
    """Largest A row-tile whose bf16 double buffer (+ residents) fits the budget."""
    resident = n_pad * FPAD * 2 + 2 * 1024 * FPAD * 2 + 64 * 1024  # hw + out dbuf + misc
    budget = max(vmem_limit - resident - (4 << 20), 1 << 20)
    for tile in (1024, 512, 256, 128, 64, 32, 16, 8):
        if n_pad % tile == 0 and 2 * tile * n_pad * 2 <= budget:
            return tile
    return 8


def _choose_pool_tile(n_pad):
    for tile in (2048, 1024, 512, 256, 128):
        if n_pad % tile == 0:
            return tile
    return 128


def _pad2(w, rows, cols, dtype):
    out = jnp.zeros((rows, cols), jnp.float32).at[: w.shape[0], : w.shape[1]].set(w)
    return out.astype(dtype)


# ----------------------------------------------------------------------------- kernels

def _layer_math(a, hw_f32, b):
    """agg = A @ HW + b ; row-L2 normalize (clamped rsqrt, EUP) ; ReLU."""
    agg = jnp.dot(a, hw_f32.astype(jnp.bfloat16),
                  preferred_element_type=jnp.float32) + b
    ss = jnp.sum(agg * agg, axis=1, keepdims=True)
    inv = lax.rsqrt(jnp.maximum(ss, 1e-24))   # == F.normalize(eps=1e-12) on the norm
    return jnp.maximum(agg * inv, 0.0)


def fused_gcn_kernel(a_ref, x_ref, w1_ref, b1_ref, w2_ref, b2_ref, w3_ref, b3_ref,
                     mask_ref, wl_ref, bl_ref, o_ref):
    # Everything resident in VMEM; A_hat is DMA'd from HBM exactly once.
    a = a_ref[...]                                     # [N_pad, N_pad] bf16
    h = x_ref[...]                                     # [N_pad, 128]   bf16

    for w_ref, b_ref in ((w1_ref, b1_ref), (w2_ref, b2_ref), (w3_ref, b3_ref)):
        hw = jnp.dot(h, w_ref[...], preferred_element_type=jnp.float32)  # [N_pad, 128]
        h = _layer_math(a, hw, b_ref[...]).astype(jnp.bfloat16)

    # global max / mean pool over real nodes, then fused linear.
    hf = h.astype(jnp.float32)
    mask = mask_ref[...]                               # [N_pad, 1]
    n_real = jnp.maximum(jnp.sum(mask), 1.0)
    hmax = jnp.max(jnp.where(mask > 0, hf, -1e30), axis=0, keepdims=True)   # [1, 128]
    hmean = jnp.sum(hf * mask, axis=0, keepdims=True) / n_real              # [1, 128]
    pooled = jnp.concatenate([hmax, hmean], axis=1)                         # [1, 256]
    o_ref[...] = (jnp.dot(pooled, wl_ref[...], preferred_element_type=jnp.float32)
                  + bl_ref[...])


def gcn_layer_kernel(a_ref, hw_ref, b_ref, o_ref):
    # a_ref : [TILE_N, N_pad] bf16  rows of normalized adjacency (pipelined)
    # hw_ref: [N_pad, 128]    bf16  H @ W pre-folded in the wrapper (resident)
    # b_ref : [1, 128]        f32
    # o_ref : [TILE_N, 128]   bf16  lane-dense output
    agg = jnp.dot(a_ref[...], hw_ref[...], preferred_element_type=jnp.float32) + b_ref[...]
    ss = jnp.sum(agg * agg, axis=1, keepdims=True)
    inv = lax.rsqrt(jnp.maximum(ss, 1e-24))
    o_ref[...] = jnp.maximum(agg * inv, 0.0).astype(o_ref.dtype)


def pool_linear_kernel(h_ref, mask_ref, wl_ref, bl_ref, o_ref, max_sc, sum_sc, cnt_sc):
    # Row-tiled running max/sum pooling with pl.when init/finalize.
    i = pl.program_id(0)

    @pl.when(i == 0)
    def _():
        max_sc[...] = jnp.full_like(max_sc, -1e30)
        sum_sc[...] = jnp.zeros_like(sum_sc)
        cnt_sc[...] = jnp.zeros_like(cnt_sc)

    h = h_ref[...].astype(jnp.float32)      # [TILE, 128]
    m = mask_ref[...]                       # [TILE, 1]
    max_sc[...] = jnp.maximum(
        max_sc[...], jnp.max(jnp.where(m > 0, h, -1e30), axis=0, keepdims=True))
    sum_sc[...] = sum_sc[...] + jnp.sum(h * m, axis=0, keepdims=True)
    cnt_sc[...] = cnt_sc[...] + jnp.sum(m).reshape(1, 1)

    @pl.when(i == pl.num_programs(0) - 1)
    def _():
        n_real = jnp.maximum(cnt_sc[...], 1.0)                              # [1, 1]
        pooled = jnp.concatenate([max_sc[...], sum_sc[...] / n_real], axis=1)  # [1, 256]
        o_ref[...] = (jnp.dot(pooled, wl_ref[...], preferred_element_type=jnp.float32)
                      + bl_ref[...])


# ----------------------------------------------------------------------------- wrappers

def fused_forward(a_hat, x_pad, w_pads, b_pads, mask, wl_pad, bl_pad,
                  num_classes, vmem_limit):
    n_pad = a_hat.shape[0]
    c_pad = wl_pad.shape[1]
    vmem = pl.BlockSpec(memory_space=pltpu.MemorySpace.VMEM)
    cost = pl.CostEstimate(
        flops=3 * (2 * n_pad * n_pad * FPAD + 2 * n_pad * FPAD * FPAD)
        + 2 * 2 * FPAD * c_pad,
        transcendentals=3 * n_pad,
        bytes_accessed=a_hat.size * 2 + x_pad.size * 2
        + sum(w.size * 2 for w in w_pads) + sum(b.size * 4 for b in b_pads)
        + mask.size * 4 + wl_pad.size * 4 + bl_pad.size * 4 + c_pad * 4,
    )
    out = pl.pallas_call(
        fused_gcn_kernel,
        out_shape=jax.ShapeDtypeStruct((1, c_pad), jnp.float32),
        in_specs=[vmem] * 11,
        out_specs=vmem,
        compiler_params=pltpu.CompilerParams(vmem_limit_bytes=vmem_limit),
        cost_estimate=cost,
    )(a_hat, x_pad, w_pads[0], b_pads[0], w_pads[1], b_pads[1], w_pads[2], b_pads[2],
      mask, wl_pad, bl_pad)
    return out[:, :num_classes]


def gcn_layer_tiled(a_hat, hw, b_pad, tile_n, vmem_limit):
    n_pad = a_hat.shape[0]
    grid = (n_pad // tile_n,)
    cost = pl.CostEstimate(
        flops=2 * n_pad * n_pad * FPAD,
        transcendentals=n_pad,
        bytes_accessed=a_hat.size * 2 + hw.size * 2 + b_pad.size * 4 + n_pad * FPAD * 2,
    )
    return pl.pallas_call(
        gcn_layer_kernel,
        out_shape=jax.ShapeDtypeStruct((n_pad, FPAD), jnp.bfloat16),
        grid_spec=pltpu.PrefetchScalarGridSpec(
            num_scalar_prefetch=0,
            grid=grid,
            in_specs=[
                pl.BlockSpec((tile_n, n_pad), lambda i: (i, 0)),   # A row tiles (pipelined)
                pl.BlockSpec((n_pad, FPAD), lambda i: (0, 0)),     # H @ W (resident)
                pl.BlockSpec((1, FPAD), lambda i: (0, 0)),         # bias
            ],
            out_specs=pl.BlockSpec((tile_n, FPAD), lambda i: (i, 0)),
        ),
        compiler_params=pltpu.CompilerParams(
            dimension_semantics=("parallel",),
            vmem_limit_bytes=vmem_limit,
        ),
        cost_estimate=cost,
    )(a_hat, hw, b_pad)


def pool_linear_tiled(h3, mask, wl_pad, bl_pad, num_classes, vmem_limit):
    n_pad = h3.shape[0]
    c_pad = wl_pad.shape[1]
    tile_n = _choose_pool_tile(n_pad)
    grid = (n_pad // tile_n,)
    cost = pl.CostEstimate(
        flops=4 * n_pad * FPAD + 2 * 2 * FPAD * c_pad,
        transcendentals=0,
        bytes_accessed=h3.size * 2 + mask.size * 4 + wl_pad.size * 4
        + bl_pad.size * 4 + c_pad * 4,
    )
    out = pl.pallas_call(
        pool_linear_kernel,
        out_shape=jax.ShapeDtypeStruct((1, c_pad), jnp.float32),
        grid_spec=pltpu.PrefetchScalarGridSpec(
            num_scalar_prefetch=0,
            grid=grid,
            in_specs=[
                pl.BlockSpec((tile_n, FPAD), lambda i: (i, 0)),
                pl.BlockSpec((tile_n, 1), lambda i: (i, 0)),
                pl.BlockSpec((2 * FPAD, c_pad), lambda i: (0, 0)),
                pl.BlockSpec((1, c_pad), lambda i: (0, 0)),
            ],
            out_specs=pl.BlockSpec((1, c_pad), lambda i: (0, 0)),
            scratch_shapes=[
                pltpu.VMEM((1, FPAD), jnp.float32),   # running max
                pltpu.VMEM((1, FPAD), jnp.float32),   # running sum
                pltpu.VMEM((1, 1), jnp.float32),      # running count
            ],
        ),
        compiler_params=pltpu.CompilerParams(
            dimension_semantics=("arbitrary",),
            vmem_limit_bytes=vmem_limit,
        ),
        cost_estimate=cost,
    )(h3, mask, wl_pad, bl_pad)
    return out[:, :num_classes]


def build_norm_adj(edge_index, edge_weights, num_nodes, n_pad, dtype=jnp.bfloat16):
    """Dense equivalent of PyG GCNConv gcn_norm (add_self_loops=True), padded,
    scattered directly into the target dtype (no extra f32 copy in HBM)."""
    row, col = edge_index[0], edge_index[1]
    loop = jnp.arange(num_nodes, dtype=row.dtype)
    row = jnp.concatenate([row, loop])
    col = jnp.concatenate([col, loop])
    ew = jnp.concatenate([edge_weights.astype(jnp.float32),
                          jnp.ones((num_nodes,), jnp.float32)])
    deg = jnp.zeros((num_nodes,), jnp.float32).at[col].add(ew)
    dinv = jnp.where(deg > 0, lax.rsqrt(deg), 0.0)
    norm = (dinv[row] * ew * dinv[col]).astype(dtype)
    # message flows source (row) -> target (col): A_hat[target, source]
    return jnp.zeros((n_pad, n_pad), dtype).at[col, row].add(norm)


def graph_gcn_forward(x, edge_index, params, edge_weights=None, batch=None,
                      tile_n=None, force_tiled=False):
    # batch=None (single graph) path only — matches the module default.
    n, f = x.shape
    n_pad = _round_up(max(n, 1), LANE)
    if edge_weights is None:
        edge_weights = jnp.ones((edge_index.shape[1],), jnp.float32)

    a_hat = build_norm_adj(edge_index, edge_weights, n, n_pad, jnp.bfloat16)
    x_pad = jnp.zeros((n_pad, FPAD), jnp.float32).at[:n, :f].set(x).astype(jnp.bfloat16)
    mask = (jnp.arange(n_pad) < n).astype(jnp.float32)[:, None]

    (w1, b1, w2, b2, w3, b3, wl, bl) = params
    num_classes = wl.shape[1]
    c_pad = _round_up(num_classes, LANE)

    # Lane-dense (128-wide) parameter padding.  Padded feature lanes stay zero
    # through all layers (zero weight columns, zero bias), padded node rows carry
    # bias-derived junk but A_hat's padded columns are zero and pooling masks them.
    w_pads = (_pad2(w1, FPAD, FPAD, jnp.bfloat16),
              _pad2(w2, FPAD, FPAD, jnp.bfloat16),
              _pad2(w3, FPAD, FPAD, jnp.bfloat16))
    b_pads = (_pad2(b1, 1, FPAD, jnp.float32),
              _pad2(b2, 1, FPAD, jnp.float32),
              _pad2(b3, 1, FPAD, jnp.float32))
    wl_pad = jnp.zeros((2 * FPAD, c_pad), jnp.float32)
    wl_pad = wl_pad.at[:EMBED, :num_classes].set(wl[:EMBED])
    wl_pad = wl_pad.at[FPAD:FPAD + EMBED, :num_classes].set(wl[EMBED:])
    bl_pad = jnp.zeros((1, c_pad), jnp.float32).at[:, :num_classes].set(bl)

    cap = _vmem_capacity_bytes()
    vmem_limit = _vmem_limit_bytes(cap)

    # Fused path: A_hat + working activations resident in VMEM (A read once).
    fused_bytes = n_pad * n_pad * 2 + 12 * n_pad * FPAD * 4
    if not force_tiled and fused_bytes <= int(0.55 * cap):
        return fused_forward(a_hat, x_pad, w_pads, b_pads, mask, wl_pad, bl_pad,
                             num_classes, vmem_limit)

    # Tiled path: per-layer row-tiled streaming of A_hat, H@W pre-folded.
    if tile_n is None:
        tile_n = _choose_tile(n_pad, vmem_limit)

    h = x_pad
    for w_pad, b_pad in zip(w_pads, b_pads):
        hw = jnp.dot(h.astype(jnp.float32), w_pad.astype(jnp.float32),
                     preferred_element_type=jnp.float32).astype(jnp.bfloat16)
        h = gcn_layer_tiled(a_hat, hw, b_pad, tile_n, vmem_limit)

    return pool_linear_tiled(h, mask, wl_pad, bl_pad, num_classes, vmem_limit)


# ----------------------------------------------------------------------------- reference & init

def reference_forward_f32(x, edge_index, edge_weights, params):
    """Pure-JAX f32 reference of GraphGCN.forward (batch=None)."""
    n = x.shape[0]
    row, col = edge_index[0], edge_index[1]
    loop = jnp.arange(n, dtype=row.dtype)
    row = jnp.concatenate([row, loop])
    col = jnp.concatenate([col, loop])
    ew = jnp.concatenate([edge_weights, jnp.ones((n,), jnp.float32)])
    deg = jnp.zeros((n,), jnp.float32).at[col].add(ew)
    dinv = jnp.where(deg > 0, 1.0 / jnp.sqrt(deg), 0.0)
    norm = dinv[row] * ew * dinv[col]
    a = jnp.zeros((n, n), jnp.float32).at[col, row].add(norm)

    (w1, b1, w2, b2, w3, b3, wl, bl) = params
    h = x
    for (w, b) in ((w1, b1), (w2, b2), (w3, b3)):
        out = a @ (h @ w) + b
        nrm = jnp.maximum(jnp.sqrt(jnp.sum(out * out, axis=1, keepdims=True)), 1e-12)
        h = jnp.maximum(out / nrm, 0.0)
    pooled = jnp.concatenate([h.max(axis=0, keepdims=True),
                              h.mean(axis=0, keepdims=True)], axis=1)
    return pooled @ wl + bl


def init_params(key, num_features, num_classes):
    ks = jax.random.split(key, 8)

    def glorot(k, fin, fout):
        lim = (6.0 / (fin + fout)) ** 0.5
        return jax.random.uniform(k, (fin, fout), jnp.float32, -lim, lim)

    w1 = glorot(ks[0], num_features, EMBED)
    b1 = jnp.zeros((1, EMBED), jnp.float32)
    w2 = glorot(ks[1], EMBED, EMBED)
    b2 = jnp.zeros((1, EMBED), jnp.float32)
    w3 = glorot(ks[2], EMBED, EMBED)
    b3 = jnp.zeros((1, EMBED), jnp.float32)
    wl = glorot(ks[3], 2 * EMBED, num_classes)       # torch Linear weight, transposed
    bl = 0.01 * jax.random.normal(ks[4], (1, num_classes), jnp.float32)
    return (w1, b1, w2, b2, w3, b3, wl, bl)


if __name__ == "__main__":
    key = jax.random.PRNGKey(0)
    num_nodes = 16
    num_features = 10
    num_classes = 2

    k_x, k_p = jax.random.split(key)
    x = jax.random.normal(k_x, (num_nodes, num_features), jnp.float32)

    # simple deterministic ring graph, both directions
    src = jnp.arange(num_nodes, dtype=jnp.int32)
    dst = (src + 1) % num_nodes
    edge_index = jnp.stack([jnp.concatenate([src, dst]),
                            jnp.concatenate([dst, src])], axis=0)  # [2, 2N]
    ew = jnp.ones((edge_index.shape[1],), jnp.float32)

    params = init_params(k_p, num_features, num_classes)

    out_fused = graph_gcn_forward(x, edge_index, params)                    # A-resident fused path
    out_tiled = graph_gcn_forward(x, edge_index, params, force_tiled=True)  # row-tiled streaming path
    jax.block_until_ready((out_fused, out_tiled))

    assert out_fused.shape == (1, num_classes)
    assert out_tiled.shape == (1, num_classes)

    ref = reference_forward_f32(x, edge_index, ew, params)
    assert bool(jnp.allclose(out_fused, ref, atol=5e-2, rtol=5e-2))
    assert bool(jnp.allclose(out_tiled, ref, atol=5e-2, rtol=5e-2))

    print("KERNEL_OK")
</pallas_src>

<mosaic_0001>
module attributes {stable_mosaic.version = 11 : i64} {
  func.func @fused_gcn_kernel(%arg0: memref<128x128xbf16, #tpu.memory_space<vmem>>, %arg1: memref<128x128xbf16, #tpu.memory_space<vmem>>, %arg2: memref<128x128xbf16, #tpu.memory_space<vmem>>, %arg3: memref<1x128xf32, #tpu.memory_space<vmem>>, %arg4: memref<128x128xbf16, #tpu.memory_space<vmem>>, %arg5: memref<1x128xf32, #tpu.memory_space<vmem>>, %arg6: memref<128x128xbf16, #tpu.memory_space<vmem>>, %arg7: memref<1x128xf32, #tpu.memory_space<vmem>>, %arg8: memref<128x1xf32, #tpu.memory_space<vmem>>, %arg9: memref<256x128xf32, #tpu.memory_space<vmem>>, %arg10: memref<1x128xf32, #tpu.memory_space<vmem>>, %arg11: memref<1x128xf32, #tpu.memory_space<vmem>>) attributes {dimension_semantics = [], scalar_prefetch = 0 : i64, scratch_operands = 0 : i64, tpu.core_type = #tpu.core_type<tc>} {
    %c0 = arith.constant 0 : index
    %c0_0 = arith.constant 0 : index
    %0 = vector.load %arg0[%c0, %c0_0] : memref<128x128xbf16, #tpu.memory_space<vmem>>, vector<128x128xbf16>
    %c0_1 = arith.constant 0 : index
    %c0_2 = arith.constant 0 : index
    %1 = vector.load %arg1[%c0_1, %c0_2] : memref<128x128xbf16, #tpu.memory_space<vmem>>, vector<128x128xbf16>
    %c0_3 = arith.constant 0 : index
    %c0_4 = arith.constant 0 : index
    %2 = vector.load %arg2[%c0_3, %c0_4] : memref<128x128xbf16, #tpu.memory_space<vmem>>, vector<128x128xbf16>
    %cst = arith.constant dense<0.000000e+00> : vector<128x128xf32>
    %3 = tpu.matmul %1, %2, %cst {dimension_numbers = #tpu.dot_dimension_numbers<[1], [0], [0], [1], [0, 0, 1, 1], [], []>} : vector<128x128xbf16>, vector<128x128xbf16>, vector<128x128xf32> -> vector<128x128xf32>
    %c0_5 = arith.constant 0 : index
    %c0_6 = arith.constant 0 : index
    %4 = vector.load %arg3[%c0_5, %c0_6] : memref<1x128xf32, #tpu.memory_space<vmem>>, vector<1x128xf32>
    %5 = arith.truncf %3 : vector<128x128xf32> to vector<128x128xbf16>
    %cst_7 = arith.constant dense<0.000000e+00> : vector<128x128xf32>
    %6 = tpu.matmul %0, %5, %cst_7 {dimension_numbers = #tpu.dot_dimension_numbers<[1], [0], [0], [1], [0, 0, 1, 1], [], []>} : vector<128x128xbf16>, vector<128x128xbf16>, vector<128x128xf32> -> vector<128x128xf32>
    %7 = vector.broadcast %4 : vector<1x128xf32> to vector<128x128xf32>
    %8 = arith.addf %6, %7 : vector<128x128xf32>
    %9 = arith.mulf %8, %8 : vector<128x128xf32>
    %cst_8 = arith.constant dense<0.000000e+00> : vector<128xf32>
    %10 = vector.multi_reduction <add>, %9, %cst_8 [1] : vector<128x128xf32> to vector<128xf32>
    %11 = vector.shape_cast %10 : vector<128xf32> to vector<128x1xf32>
    %cst_9 = arith.constant 1.000000e-24 : f32
    %12 = vector.broadcast %cst_9 : f32 to vector<128x1xf32>
    %13 = arith.maximumf %11, %12 : vector<128x1xf32>
    %14 = math.rsqrt %13 : vector<128x1xf32>
    %15 = vector.broadcast %14 : vector<128x1xf32> to vector<128x128xf32>
    %16 = arith.mulf %8, %15 : vector<128x128xf32>
    %cst_10 = arith.constant 0.000000e+00 : f32
    %17 = vector.broadcast %cst_10 : f32 to vector<128x128xf32>
    %18 = arith.maximumf %16, %17 : vector<128x128xf32>
    %19 = arith.truncf %18 : vector<128x128xf32> to vector<128x128xbf16>
    %c0_11 = arith.constant 0 : index
    %c0_12 = arith.constant 0 : index
    %20 = vector.load %arg4[%c0_11, %c0_12] : memref<128x128xbf16, #tpu.memory_space<vmem>>, vector<128x128xbf16>
    %cst_13 = arith.constant dense<0.000000e+00> : vector<128x128xf32>
    %21 = tpu.matmul %19, %20, %cst_13 {dimension_numbers = #tpu.dot_dimension_numbers<[1], [0], [0], [1], [0, 0, 1, 1], [], []>} : vector<128x128xbf16>, vector<128x128xbf16>, vector<128x128xf32> -> vector<128x128xf32>
    %c0_14 = arith.constant 0 : index
    %c0_15 = arith.constant 0 : index
    %22 = vector.load %arg5[%c0_14, %c0_15] : memref<1x128xf32, #tpu.memory_space<vmem>>, vector<1x128xf32>
    %23 = arith.truncf %21 : vector<128x128xf32> to vector<128x128xbf16>
    %cst_16 = arith.constant dense<0.000000e+00> : vector<128x128xf32>
    %24 = tpu.matmul %0, %23, %cst_16 {dimension_numbers = #tpu.dot_dimension_numbers<[1], [0], [0], [1], [0, 0, 1, 1], [], []>} : vector<128x128xbf16>, vector<128x128xbf16>, vector<128x128xf32> -> vector<128x128xf32>
    %25 = vector.broadcast %22 : vector<1x128xf32> to vector<128x128xf32>
    %26 = arith.addf %24, %25 : vector<128x128xf32>
    %27 = arith.mulf %26, %26 : vector<128x128xf32>
    %cst_17 = arith.constant dense<0.000000e+00> : vector<128xf32>
    %28 = vector.multi_reduction <add>, %27, %cst_17 [1] : vector<128x128xf32> to vector<128xf32>
    %29 = vector.shape_cast %28 : vector<128xf32> to vector<128x1xf32>
    %cst_18 = arith.constant 1.000000e-24 : f32
    %30 = vector.broadcast %cst_18 : f32 to vector<128x1xf32>
    %31 = arith.maximumf %29, %30 : vector<128x1xf32>
    %32 = math.rsqrt %31 : vector<128x1xf32>
    %33 = vector.broadcast %32 : vector<128x1xf32> to vector<128x128xf32>
    %34 = arith.mulf %26, %33 : vector<128x128xf32>
    %cst_19 = arith.constant 0.000000e+00 : f32
    %35 = vector.broadcast %cst_19 : f32 to vector<128x128xf32>
    %36 = arith.maximumf %34, %35 : vector<128x128xf32>
    %37 = arith.truncf %36 : vector<128x128xf32> to vector<128x128xbf16>
    %c0_20 = arith.constant 0 : index
    %c0_21 = arith.constant 0 : index
    %38 = vector.load %arg6[%c0_20, %c0_21] : memref<128x128xbf16, #tpu.memory_space<vmem>>, vector<128x128xbf16>
    %cst_22 = arith.constant dense<0.000000e+00> : vector<128x128xf32>
    %39 = tpu.matmul %37, %38, %cst_22 {dimension_numbers = #tpu.dot_dimension_numbers<[1], [0], [0], [1], [0, 0, 1, 1], [], []>} : vector<128x128xbf16>, vector<128x128xbf16>, vector<128x128xf32> -> vector<128x128xf32>
    %c0_23 = arith.constant 0 : index
    %c0_24 = arith.constant 0 : index
    %40 = vector.load %arg7[%c0_23, %c0_24] : memref<1x128xf32, #tpu.memory_space<vmem>>, vector<1x128xf32>
    %41 = arith.truncf %39 : vector<128x128xf32> to vector<128x128xbf16>
    %cst_25 = arith.constant dense<0.000000e+00> : vector<128x128xf32>
    %42 = tpu.matmul %0, %41, %cst_25 {dimension_numbers = #tpu.dot_dimension_numbers<[1], [0], [0], [1], [0, 0, 1, 1], [], []>} : vector<128x128xbf16>, vector<128x128xbf16>, vector<128x128xf32> -> vector<128x128xf32>
    %43 = vector.broadcast %40 : vector<1x128xf32> to vector<128x128xf32>
    %44 = arith.addf %42, %43 : vector<128x128xf32>
    %45 = arith.mulf %44, %44 : vector<128x128xf32>
    %cst_26 = arith.constant dense<0.000000e+00> : vector<128xf32>
    %46 = vector.multi_reduction <add>, %45, %cst_26 [1] : vector<128x128xf32> to vector<128xf32>
    %47 = vector.shape_cast %46 : vector<128xf32> to vector<128x1xf32>
    %cst_27 = arith.constant 1.000000e-24 : f32
    %48 = vector.broadcast %cst_27 : f32 to vector<128x1xf32>
    %49 = arith.maximumf %47, %48 : vector<128x1xf32>
    %50 = math.rsqrt %49 : vector<128x1xf32>
    %51 = vector.broadcast %50 : vector<128x1xf32> to vector<128x128xf32>
    %52 = arith.mulf %44, %51 : vector<128x128xf32>
    %cst_28 = arith.constant 0.000000e+00 : f32
    %53 = vector.broadcast %cst_28 : f32 to vector<128x128xf32>
    %54 = arith.maximumf %52, %53 : vector<128x128xf32>
    %55 = arith.truncf %54 : vector<128x128xf32> to vector<128x128xbf16>
    %56 = arith.extf %55 : vector<128x128xbf16> to vector<128x128xf32>
    %c0_29 = arith.constant 0 : index
    %c0_30 = arith.constant 0 : index
    %57 = vector.load %arg8[%c0_29, %c0_30] : memref<128x1xf32, #tpu.memory_space<vmem>>, vector<128x1xf32>
    %58 = vector.shape_cast %57 : vector<128x1xf32> to vector<1x128x1xf32>
    %cst_31 = arith.constant dense<0.000000e+00> : vector<1xf32>
    %59 = vector.multi_reduction <add>, %58, %cst_31 [1, 2] : vector<1x128x1xf32> to vector<1xf32>
    %60 = vector.shape_cast %59 : vector<1xf32> to vector<1x1x1xf32>
    %61 = vector.extract %60[0, 0, 0] : f32 from vector<1x1x1xf32>
    %cst_32 = arith.constant 1.000000e+00 : f32
    %62 = arith.maximumf %61, %cst_32 : f32
    %cst_33 = arith.constant 0.000000e+00 : f32
    %63 = vector.broadcast %cst_33 : f32 to vector<128x1xf32>
    %64 = arith.cmpf ogt, %57, %63 : vector<128x1xf32>
    %cst_34 = arith.constant -1.000000e+30 : f32
    %65 = vector.shape_cast %64 : vector<128x1xi1> to vector<128x1xi1>
    %66 = vector.broadcast %65 : vector<128x1xi1> to vector<128x128xi1>
    %67 = vector.broadcast %cst_34 : f32 to vector<128x128xf32>
    %68 = arith.select %66, %56, %67 : vector<128x128xi1>, vector<128x128xf32>
    %cst_35 = arith.constant dense<0xFF800000> : vector<128xf32>
    %69 = vector.multi_reduction <maximumf>, %68, %cst_35 [0] : vector<128x128xf32> to vector<128xf32>
    %70 = vector.shape_cast %69 : vector<128xf32> to vector<1x128xf32>
    %71 = vector.broadcast %57 : vector<128x1xf32> to vector<128x128xf32>
    %72 = arith.mulf %56, %71 : vector<128x128xf32>
    %cst_36 = arith.constant dense<0.000000e+00> : vector<128xf32>
    %73 = vector.multi_reduction <add>, %72, %cst_36 [0] : vector<128x128xf32> to vector<128xf32>
    %74 = vector.shape_cast %73 : vector<128xf32> to vector<1x128xf32>
    %75 = vector.broadcast %62 : f32 to vector<1x128xf32>
    %76 = arith.divf %74, %75 : vector<1x128xf32>
    %77 = tpu.concatenate %70, %76 in 1 : vector<1x128xf32>, vector<1x128xf32> -> vector<1x256xf32>
    %c0_37 = arith.constant 0 : index
    %c0_38 = arith.constant 0 : index
    %78 = vector.load %arg9[%c0_37, %c0_38] : memref<256x128xf32, #tpu.memory_space<vmem>>, vector<256x128xf32>
    %cst_39 = arith.constant dense<0.000000e+00> : vector<1x128xf32>
    %79 = tpu.matmul %77, %78, %cst_39 {dimension_numbers = #tpu.dot_dimension_numbers<[1], [0], [0], [1], [0, 0, 1, 1], [], []>} : vector<1x256xf32>, vector<256x128xf32>, vector<1x128xf32> -> vector<1x128xf32>
    %c0_40 = arith.constant 0 : index
    %c0_41 = arith.constant 0 : index
    %80 = vector.load %arg10[%c0_40, %c0_41] : memref<1x128xf32, #tpu.memory_space<vmem>>, vector<1x128xf32>
    %81 = arith.addf %79, %80 : vector<1x128xf32>
    %c0_42 = arith.constant 0 : index
    %c0_43 = arith.constant 0 : index
    %82 = vector.load %arg11[%c0_42, %c0_43] : memref<1x128xf32, #tpu.memory_space<vmem>>, vector<1x128xf32>
    tpu.vector_store %arg11[%c0_42, %c0_43], %81 {strides = array<i32>} : memref<1x128xf32, #tpu.memory_space<vmem>>, vector<1x128xf32>,
    return
  }
}

</mosaic_0001>

<bundles_post_ra>
// kernel: tpu_custom_call.1
= control target key start
LH: loop header
LB: loop body
LE: loop exit
PB: predicated region body
PF: predicated region fallthrough
CT: control target
= control target key end

     0   :  { %16 = vsyncpa [#allocation3], 0  ;;  %s3341_s0 = inlined_call_operand.vmem [shape: bf16[128,128], index: 0, kind: input, shape index: {}]   ;;  %s3342_s1 = inlined_call_operand.vmem [shape: bf16[128,128], index: 1, kind: input, shape index: {}]   ;;  %s3343_s2 = inlined_call_operand.hbm [shape: bf16[128,128], index: 2, kind: input, shape index: {}]   ;;  %s3344_s3 = inlined_call_operand.vmem [shape: f32[1,128], index: 3, kind: input, shape index: {}]   ;;  %s3345_s4 = inlined_call_operand.hbm [shape: bf16[128,128], index: 4, kind: input, shape index: {}]   ;;  %s3346_s5 = inlined_call_operand.vmem [shape: f32[1,128], index: 5, kind: input, shape index: {}]   ;;  %s3347_s6 = inlined_call_operand.hbm [shape: bf16[128,128], index: 6, kind: input, shape index: {}]   ;;  %s3348_s7 = inlined_call_operand.vmem [shape: f32[1,128], index: 7, kind: input, shape index: {}]   ;;  %s3349_s8 = inlined_call_operand.vmem [shape: f32[128,1], index: 8, kind: input, shape index: {}]   ;;  %s3350_s9 = inlined_call_operand.hbm [shape: f32[256,128], index: 9, kind: input, shape index: {}]   ;;  %s3351_s10 = inlined_call_operand.vmem [shape: f32[1,128], index: 10, kind: input, shape index: {}]   ;;  %s3352_s11 = inlined_call_operand.hbm [shape: f32[1,128], index: 11, kind: output, shape index: {}]  }
   0x1   :  { %17 = vsyncpa [#allocation6], 0 }
   0x2   :  { %18 = vsyncpa [#allocation9], 0 }
   0x3   :  { %19 = vsyncpa [#allocation4], 0  ;;  %s2526_s17 = smov [#allocation5]   ;;  %s2527_s19 = smov [#allocation2]  }
   0x4   :  { %s43_s18 = sshll.u32 %s2526_s17, 4  ;;  %s29_s20 = sshll.u32 %s2527_s19, 4  ;;  %s44_s18 = int_to_ptr.vmem [resolvable:$true] %s43_s18  ;;  %s2597_s20 = int_to_ptr.vmem [resolvable:$true] %s29_s20 }
   0x5   :  { %s2408_s23 = scalar_lea.hbm %s3345_s4, 1024 }
   0x6   :  { %p2409_p0 = scmp.ne.s32.totalorder %s3345_s4, %s2408_s23  ;;  %p2412_p1 = scmp.lt.u32.totalorder %s2408_s23, %s3345_s4 }
   0x8   :  { %p2414_p2 = pnand %p2412_p1, %p2409_p0 }
   0xa   :  { %2417 = shalt.err (!%p2414_p2)
}
   0xb   :  { %s2418_s28 = scalar_lea.vmem %s44_s18, 1024  ;;  %p2423_p4 = scmp.lt.s32.totalorder %s44_s18, %s44_s18 }
   0xc   :  { %p2419_p3 = scmp.ne.s32.totalorder %s44_s18, %s2418_s28  ;;  %p2424_p5 = scmp.lt.s32.totalorder %s2418_s28, %s2418_s28 }
   0xe   :  { %p2425_p6 = por %p2424_p5, %p2423_p4 }
  0x10   :  { %p2426_p7 = pnand %p2425_p6, %p2419_p3 }
  0x12   :  { %2429 = shalt.err (!%p2426_p7)
}
  0x13   :  { %s2528_s29 = smov 64   ;;  %s2529_s30 = smov 4  }
  0x14   :  { %49 = dma.hbm_to_vmem [thread:$0]  %s3345_s4, 1024, %s44_s18, [#allocation6], %s2528_s29, %s2528_s29, %s2529_s30  }
  0x15   :  { %s2430_s16 = scalar_lea.hbm %s3343_s2, 1024 }
  0x16   :  { %p2431_p8 = scmp.ne.s32.totalorder %s3343_s2, %s2430_s16  ;;  %p2434_p9 = scmp.lt.u32.totalorder %s2430_s16, %s3343_s2 }
  0x18   :  { %p2436_p10 = pnand %p2434_p9, %p2431_p8 }
  0x1a   :  { %2439 = shalt.err (!%p2436_p10)
}
  0x1b   :  { %s2440_s23 = scalar_lea.vmem %s2597_s20, 1024  ;;  %p2445_p12 = scmp.lt.s32.totalorder %s2597_s20, %s2597_s20 }
  0x1c   :  { %p2441_p11 = scmp.ne.s32.totalorder %s2597_s20, %s2440_s23  ;;  %p2446_p13 = scmp.lt.s32.totalorder %s2440_s23, %s2440_s23 }
  0x1e   :  { %p2447_p0 = por %p2446_p13, %p2445_p12 }
  0x20   :  { %p2448_p1 = pnand %p2447_p0, %p2441_p11 }
  0x22   :  { %2451 = shalt.err (!%p2448_p1)
}
  0x23   :  { %35 = dma.hbm_to_vmem [thread:$0]  %s3343_s2, 1024, %s2597_s20, [#allocation3], %s2528_s29, %s2528_s29, %s2529_s30  }
  0x24   :  { %s2530_s24 = smov [#allocation7]   ;;  %s2531_s26 = smov [#allocation8]  }
  0x25   :  { %s57_s25 = sshll.u32 %s2530_s24, 4  ;;  %s73_s27 = sshll.u32 %s2531_s26, 4  ;;  %s58_s25 = int_to_ptr.vmem [resolvable:$true] %s57_s25  ;;  %s2634_s27 = int_to_ptr.vmem [resolvable:$true] %s73_s27 }
  0x26   :  { %s2452_s13 = scalar_lea.hbm %s3347_s6, 1024 }
  0x27   :  { %p2453_p2 = scmp.ne.s32.totalorder %s3347_s6, %s2452_s13  ;;  %p2456_p3 = scmp.lt.u32.totalorder %s2452_s13, %s3347_s6 }
  0x29   :  { %p2458_p4 = pnand %p2456_p3, %p2453_p2 }
  0x2b   :  { %2461 = shalt.err (!%p2458_p4)
}
  0x2c   :  { %s2462_s2 = scalar_lea.vmem %s58_s25, 1024  ;;  %p2467_p6 = scmp.lt.s32.totalorder %s58_s25, %s58_s25 }
  0x2d   :  { %p2463_p5 = scmp.ne.s32.totalorder %s58_s25, %s2462_s2  ;;  %p2468_p7 = scmp.lt.s32.totalorder %s2462_s2, %s2462_s2 }
  0x2f   :  { %p2469_p8 = por %p2468_p7, %p2467_p6 }
  0x31   :  { %p2470_p9 = pnand %p2469_p8, %p2463_p5 }
  0x33   :  { %2473 = shalt.err (!%p2470_p9)
}
  0x34   :  { %63 = dma.hbm_to_vmem [thread:$0]  %s3347_s6, 1024, %s58_s25, [#allocation6], %s2528_s29, %s2528_s29, %s2529_s30  }
  0x35   :  { %s2474_s23 = scalar_lea.hbm %s3350_s9, 4096 }
  0x36   :  { %p2475_p10 = scmp.ne.s32.totalorder %s3350_s9, %s2474_s23  ;;  %p2478_p11 = scmp.lt.u32.totalorder %s2474_s23, %s3350_s9 }
  0x38   :  { %p2480_p12 = pnand %p2478_p11, %p2475_p10 }
  0x3a   :  { %2483 = shalt.err (!%p2480_p12)
}
  0x3b   :  { %s2484_s28 = scalar_lea.vmem %s2634_s27, 4096  ;;  %p2489_p0 = scmp.lt.s32.totalorder %s2634_s27, %s2634_s27 }
  0x3c   :  { %p2485_p13 = scmp.ne.s32.totalorder %s2634_s27, %s2484_s28  ;;  %p2490_p1 = scmp.lt.s32.totalorder %s2484_s28, %s2484_s28 }
  0x3e   :  { %p2491_p2 = por %p2490_p1, %p2489_p0 }
  0x40   :  { %p2492_p3 = pnand %p2491_p2, %p2485_p13 }
  0x42   :  { %2495 = shalt.err (!%p2492_p3)
}
  0x43   :  { %s2532_s6 = smov 128   ;;  %s2533_s29 = smov 8  }
  0x44   :  { %79 = dma.hbm_to_vmem [thread:$0]  %s3350_s9, 4096, %s2634_s27, [#allocation9], %s2532_s6, %s2532_s6, %s2533_s29  }
  0x45   :  { %2518 = dma.done.wait [#allocation3], 1024  }
  0x46   :  { %2519 = vsyncadd [#allocation3], 4294966272 }
  0x47   :  { %2520 = dma.done.wait [#allocation6], 2048  }
  0x48   :  { %2521 = vsyncadd [#allocation6], 4294965248 }
  0x49   :  { %2522 = dma.done.wait [#allocation9], 4096  }
  0x4a   :  { %2523 = vsyncadd [#allocation9], 4294963200  ;;  %v2263_v0 = vld [vmem:[#allocation2] sm:$0xff]   ;;  %v2264_v1 = vld [vmem:[#allocation2 + $0x8] sm:$0xff]   ;;  %vm1434_vm0 = vcmask 7168  }
  0x4b   :  { %2024 = vmatprep.subr.bf16.mxu0 %v2263_v0  ;;  %v2265_v2 = vld [vmem:[#allocation2 + $0x10] sm:$0xff]   ;;  %v2266_v3 = vld [vmem:[#allocation2 + $0x18] sm:$0xff]   ;;  %v2271_v4 = vld [vmem:[%s3342_s1] sm:$0xff]  }
  0x4c   :  { %2025 = vmatpush3.bf16.msra.mxu0 %v2263_v0  ;;  %2040 = vmatprep.mubr.bf16.mxu0 %v2271_v4  ;;  %v2267_v5 = vld [vmem:[#allocation2 + $0x20] sm:$0xff]   ;;  %v2268_v6 = vld [vmem:[#allocation2 + $0x28] sm:$0xff]   ;;  %v2269_v7 = vld [vmem:[#allocation2 + $0x30] sm:$0xff]  }
  0x4d   :  { %2026 = vmatprep.subr.bf16.mxu0 %v2264_v1  ;;  %v2270_v8 = vld [vmem:[#allocation2 + $0x38] sm:$0xff]   ;;  %v2272_v9 = vld [vmem:[%s3342_s1 + $0x8] sm:$0xff]   ;;  %v2273_v10 = vld [vmem:[%s3342_s1 + $0x10] sm:$0xff]  }
  0x4e   :  { %v2274_v11 = vld [vmem:[%s3342_s1 + $0x18] sm:$0xff]   ;;  %v2275_v12 = vld [vmem:[%s3342_s1 + $0x20] sm:$0xff]   ;;  %v2276_v13 = vld [vmem:[%s3342_s1 + $0x28] sm:$0xff]  }
  0x4f   :  { %v2277_v14 = vld [vmem:[%s3342_s1 + $0x30] sm:$0xff]   ;;  %v2278_v15 = vld [vmem:[%s3342_s1 + $0x38] sm:$0xff]   ;;  %v2695_v16 = vld [vmem:[%s3341_s0] sm:$0xff]  }
  0x50   :  { %2027 = vmatpush3.bf16.msra.mxu0 %v2264_v1  ;;  %2072 = vmatprep.mubr.bf16.mxu1 %v2695_v16  ;;  %v2701_v41 = vld [vmem:[%s3341_s0 + $0x8] sm:$0xff]   ;;  %v2706_v42 = vld [vmem:[%s3341_s0 + $0x10] sm:$0xff]   ;;  %v2713_v43 = vld [vmem:[%s3341_s0 + $0x18] sm:$0xff]  }
  0x51   :  { %2028 = vmatprep.subr.bf16.mxu0 %v2265_v2  ;;  %v2718_v44 = vld [vmem:[%s3341_s0 + $0x20] sm:$0xff]   ;;  %v2725_v45 = vld [vmem:[%s3341_s0 + $0x28] sm:$0xff]   ;;  %v2730_v46 = vld [vmem:[%s3341_s0 + $0x30] sm:$0xff]  }
  0x52   :  { %v2737_v47 = vld [vmem:[%s3341_s0 + $0x38] sm:$0xff]   ;;  %v2287_v48 = vld [vmem:[#allocation5] sm:$0xff]   ;;  %v2288_v49 = vld [vmem:[#allocation5 + $0x8] sm:$0xff]  }
  0x53   :  { %v2744_v50 = vld [vmem:[%s3344_s3] ss:$0 sm:$0xff]  ;;  %s2536_s3 = smov [#allocation10]  }
  0x54   :  { %2029 = vmatpush3.bf16.msra.mxu0 %v2265_v2  ;;  %s1839_s19 = sshll.u32 %s2536_s3, 4  ;;  %s1840_s19 = int_to_ptr.vmem [resolvable:$true] %s1839_s19 }
  0x55   :  { %2030 = vmatprep.subr.bf16.mxu0 %v2266_v3  ;;  %s2500_s21 = scalar_lea.vmem %s1840_s19, 32  ;;  %p2501_p5 = scmp.lt.s32.totalorder %s1840_s19, %s1840_s19 }
  0x58   :  { %2031 = vmatpush3.bf16.msra.mxu0 %v2266_v3 }
  0x59   :  { %2032 = vmatprep.subr.bf16.mxu0 %v2267_v5 }
  0x5c   :  { %2033 = vmatpush3.bf16.msra.mxu0 %v2267_v5 }
  0x5d   :  { %2034 = vmatprep.subr.bf16.mxu0 %v2268_v6 }
  0x60   :  { %2035 = vmatpush3.bf16.msra.mxu0 %v2268_v6 }
  0x61   :  { %2036 = vmatprep.subr.bf16.mxu0 %v2269_v7 }
  0x64   :  { %2037 = vmatpush3.bf16.msra.mxu0 %v2269_v7 }
  0x65   :  { %2038 = vmatprep.subr.bf16.mxu0 %v2270_v8 }
  0x68   :  { %2039 = vmatpush3.bf16.msra.mxu0 %v2270_v8 }
  0x69   :  { %2088 = vmatprep.subr.bf16.mxu0 %v2287_v48 }
  0x6b   :  { %2041 = vmatmul.mubr.bf16.vlgmr.msra.gmra.mrb[0].mxu0 %v2272_v9 }
  0x6c   :  { %2044 = vmatprep.mubr.bf16.mxu0 %v2273_v10  ;;  %2089 = vmatpush3.bf16.msra.mxu0 %v2287_v48  ;;  %v2294_v48 = vld [vmem:[#allocation5 + $0x38] sm:$0xff]  }
  0x6d   :  { %2090 = vmatprep.subr.bf16.mxu0 %v2288_v49 }
  0x70   :  { %2091 = vmatpush3.bf16.msra.mxu0 %v2288_v49 }
  0x73   :  { %2045 = vmatmul.mubr.bf16.gmra.mrb[4].mxu0 %v2274_v11 }
  0x74   :  { %2048 = vmatprep.mubr.bf16.mxu0 %v2275_v12 }
  0x7b   :  { %2049 = vmatmul.mubr.bf16.gmra.mrb[8].mxu0 %v2276_v13 }
  0x7c   :  { %2052 = vmatprep.mubr.bf16.mxu0 %v2277_v14 }
  0x83   :  { %2053 = vmatmul.mubr.bf16.gmra.mrb[12].mxu0 %v2278_v15  ;;  %v2289_v15 = vld [vmem:[#allocation5 + $0x10] sm:$0xff]  }
  0x84   :  { %2092 = vmatprep.subr.bf16.mxu0 %v2289_v15 }
  0x85   :  { %2093 = vmatpush3.bf16.msra.mxu0 %v2289_v15 }
 0x13e   :  { %v2042_v17 = vpop.f32.mrb[0].mxu0 }
 0x13f   :  { %v273_v18 = vpop.f32.mrb[1].mxu0 }
 0x140   :  { %v2043_v19 = vpop.f32.mrb[2].mxu0 }
 0x141   :  { %v338_v20 = vpack.c.bf16 %v2043_v19, %v2042_v17  ;;  %v276_v21 = vpop.f32.mrb[3].mxu0 }
 0x142   :  { %v337_v22 = vpack.c.bf16 %v276_v21, %v273_v18 }
 0x144   :  { %2056 = vmatprep.subr.bf16.mxu1 %v337_v22 }
 0x145   :  { %2057 = vmatpush3.bf16.msra.mxu1 %v337_v22 }
 0x146   :  { %v2046_v23 = vpop.f32.mrb[4].mxu0  ;;  %2058 = vmatprep.subr.bf16.mxu1 %v338_v20 }
 0x147   :  { %v289_v24 = vpop.f32.mrb[5].mxu0 }
 0x148   :  { %v2047_v25 = vpop.f32.mrb[6].mxu0 }
 0x149   :  { %v340_v26 = vpack.c.bf16 %v2047_v25, %v2046_v23  ;;  %v292_v27 = vpop.f32.mrb[7].mxu0  ;;  %2059 = vmatpush3.bf16.msra.mxu1 %v338_v20  ;;  %v2290_v23 = vld [vmem:[#allocation5 + $0x18] sm:$0xff]  }
 0x14a   :  { %v339_v28 = vpack.c.bf16 %v292_v27, %v289_v24  ;;  %2094 = vmatprep.subr.bf16.mxu0 %v2290_v23 }
 0x14b   :  { %2095 = vmatpush3.bf16.msra.mxu0 %v2290_v23 }
 0x14c   :  { %2060 = vmatprep.subr.bf16.mxu1 %v339_v28 }
 0x14d   :  { %2061 = vmatpush3.bf16.msra.mxu1 %v339_v28 }
 0x14e   :  { %v2050_v29 = vpop.f32.mrb[8].mxu0  ;;  %2062 = vmatprep.subr.bf16.mxu1 %v340_v26 }
 0x14f   :  { %v305_v30 = vpop.f32.mrb[9].mxu0 }
 0x150   :  { %v2051_v31 = vpop.f32.mrb[10].mxu0 }
 0x151   :  { %v342_v32 = vpack.c.bf16 %v2051_v31, %v2050_v29  ;;  %v308_v33 = vpop.f32.mrb[11].mxu0  ;;  %2063 = vmatpush3.bf16.msra.mxu1 %v340_v26 }
 0x152   :  { %v341_v34 = vpack.c.bf16 %v308_v33, %v305_v30  ;;  %v2291_v30 = vld [vmem:[#allocation5 + $0x20] sm:$0xff]  }
 0x153   :  { %2096 = vmatprep.subr.bf16.mxu0 %v2291_v30 }
 0x154   :  { %2064 = vmatprep.subr.bf16.mxu1 %v341_v34  ;;  %2097 = vmatpush3.bf16.msra.mxu0 %v2291_v30 }
 0x155   :  { %2065 = vmatpush3.bf16.msra.mxu1 %v341_v34 }
 0x156   :  { %v2054_v35 = vpop.f32.mrb[12].mxu0  ;;  %2066 = vmatprep.subr.bf16.mxu1 %v342_v32 }
 0x157   :  { %v321_v36 = vpop.f32.mrb[13].mxu0 }
 0x158   :  { %v2055_v37 = vpop.f32.mrb[14].mxu0 }
 0x159   :  { %v344_v38 = vpack.c.bf16 %v2055_v37, %v2054_v35  ;;  %v324_v39 = vpop.f32.mrb[15].mxu0  ;;  %2067 = vmatpush3.bf16.msra.mxu1 %v342_v32  ;;  %v2292_v37 = vld [vmem:[#allocation5 + $0x28] sm:$0xff]  }
 0x15a   :  { %v343_v40 = vpack.c.bf16 %v324_v39, %v321_v36  ;;  %2098 = vmatprep.subr.bf16.mxu0 %v2292_v37 }
 0x15b   :  { %2099 = vmatpush3.bf16.msra.mxu0 %v2292_v37 }
 0x15c   :  { %2068 = vmatprep.subr.bf16.mxu1 %v343_v40 }
 0x15d   :  { %2069 = vmatpush3.bf16.msra.mxu1 %v343_v40  ;;  %v2293_v40 = vld [vmem:[#allocation5 + $0x30] sm:$0xff]  }
 0x15e   :  { %2070 = vmatprep.subr.bf16.mxu1 %v344_v38  ;;  %2100 = vmatprep.subr.bf16.mxu0 %v2293_v40 }
 0x15f   :  { %2101 = vmatpush3.bf16.msra.mxu0 %v2293_v40 }
 0x160   :  { %2102 = vmatprep.subr.bf16.mxu0 %v2294_v48 }
 0x161   :  { %2071 = vmatpush3.bf16.msra.mxu1 %v344_v38 }
 0x163   :  { %2103 = vmatpush3.bf16.msra.mxu0 %v2294_v48 }
 0x164   :  { %2073 = vmatmul.mubr.bf16.vlgmr.msra.gmra.mrb[0].mxu1 %v2701_v41 }
 0x165   :  { %2076 = vmatprep.mubr.bf16.mxu1 %v2706_v42 }
 0x16c   :  { %2077 = vmatmul.mubr.bf16.gmra.mrb[4].mxu1 %v2713_v43 }
 0x16d   :  { %2080 = vmatprep.mubr.bf16.mxu1 %v2718_v44 }
 0x174   :  { %2081 = vmatmul.mubr.bf16.gmra.mrb[8].mxu1 %v2725_v45 }
 0x175   :  { %2084 = vmatprep.mubr.bf16.mxu1 %v2730_v46 }
 0x17c   :  { %2085 = vmatmul.mubr.bf16.gmra.mrb[12].mxu1 %v2737_v47 }
 0x17d   :  { %2136 = vmatprep.mubr.bf16.mxu1 %v2695_v16 }
 0x237   :  { %v2074_v51 = vpop.f32.mrb[0].mxu1 }
 0x238   :  { %v2747_v52 = vadd.f32 %v2074_v51, %v2744_v50  ;;  %v433_v53 = vpop.f32.mrb[1].mxu1 }
 0x239   :  { %v2750_v54 = vadd.f32 %v2744_v50, %v433_v53  ;;  %v2075_v55 = vpop.f32.mrb[2].mxu1 }
 0x23a   :  { %v2753_v56 = vadd.f32 %v2075_v55, %v2744_v50  ;;  %v436_v57 = vpop.f32.mrb[3].mxu1  ;;  %v498_v58 = vmul.f32 %v2747_v52, %v2747_v52 }
 0x23b   :  { %v2758_v59 = vadd.f32 %v2744_v50, %v436_v57  ;;  %v496_v60 = vmul.f32 %v2750_v54, %v2750_v54 }
 0x23c   :  { %516 = vadd.xlane.f32.xlu1 %v498_v58  ;;  %v499_v61 = vmul.f32 %v2753_v56, %v2753_v56 }
 0x23d   :  { %512 = vadd.xlane.f32.xlu0 %v496_v60  ;;  %v497_v63 = vmul.f32 %v2758_v59, %v2758_v59 }
 0x23f   :  { %v2078_v62 = vpop.f32.mrb[4].mxu1 }
 0x240   :  { %518 = vadd.xlane.f32.xlu1 %v499_v61  ;;  %v449_v0 = vpop.f32.mrb[5].mxu1  ;;  %v2770_v4 = vadd.f32 %v2078_v62, %v2744_v50 }
 0x241   :  { %v2767_v1 = vadd.f32 %v2744_v50, %v449_v0  ;;  %v2079_v2 = vpop.f32.mrb[6].mxu1  ;;  %514 = vadd.xlane.f32.xlu0 %v497_v63 }
 0x242   :  { %v452_v3 = vpop.f32.mrb[7].mxu1  ;;  %v2778_v7 = vadd.f32 %v2079_v2, %v2744_v50  ;;  %v502_v10 = vmul.f32 %v2770_v4, %v2770_v4 }
 0x243   :  { %v2773_v5 = vadd.f32 %v2744_v50, %v452_v3  ;;  %v500_v6 = vmul.f32 %v2767_v1, %v2767_v1 }
 0x244   :  { %v503_v14 = vmul.f32 %v2778_v7, %v2778_v7 }
 0x245   :  { %520 = vadd.xlane.f32.xlu0 %v500_v6  ;;  %v501_v8 = vmul.f32 %v2773_v5, %v2773_v5 }
 0x247   :  { %v2082_v9 = vpop.f32.mrb[8].mxu1  ;;  %522 = vadd.xlane.f32.xlu1 %v501_v8 }
 0x248   :  { %v465_v11 = vpop.f32.mrb[9].mxu1  ;;  %v2790_v18 = vadd.f32 %v2082_v9, %v2744_v50 }
 0x249   :  { %v2785_v12 = vadd.f32 %v2744_v50, %v465_v11  ;;  %v2083_v13 = vpop.f32.mrb[10].mxu1  ;;  %524 = vadd.xlane.f32.xlu0 %v502_v10 }
 0x24a   :  { %v468_v17 = vpop.f32.mrb[11].mxu1  ;;  %v2798_v21 = vadd.f32 %v2083_v13, %v2744_v50  ;;  %v506_v25 = vmul.f32 %v2790_v18, %v2790_v18 }
 0x24b   :  { %v2793_v19 = vadd.f32 %v2744_v50, %v468_v17  ;;  %526 = vadd.xlane.f32.xlu1 %v503_v14  ;;  %v504_v20 = vmul.f32 %v2785_v12, %v2785_v12 }
 0x24c   :  { %v507_v29 = vmul.f32 %v2798_v21, %v2798_v21 }
 0x24d   :  { %528 = vadd.xlane.f32.xlu0 %v504_v20  ;;  %v505_v22 = vmul.f32 %v2793_v19, %v2793_v19 }
 0x24f   :  { %v2086_v24 = vpop.f32.mrb[12].mxu1  ;;  %530 = vadd.xlane.f32.xlu1 %v505_v22 }
 0x250   :  { %v481_v26 = vpop.f32.mrb[13].mxu1  ;;  %v2810_v32 = vadd.f32 %v2086_v24, %v2744_v50 }
 0x251   :  { %v2805_v27 = vadd.f32 %v2744_v50, %v481_v26  ;;  %v2087_v28 = vpop.f32.mrb[14].mxu1  ;;  %532 = vadd.xlane.f32.xlu0 %v506_v25 }
 0x252   :  { %v484_v31 = vpop.f32.mrb[15].mxu1  ;;  %v2818_v35 = vadd.f32 %v2087_v28, %v2744_v50  ;;  %v510_v38 = vmul.f32 %v2810_v32, %v2810_v32 }
 0x253   :  { %v2813_v33 = vadd.f32 %v2744_v50, %v484_v31  ;;  %534 = vadd.xlane.f32.xlu1 %v507_v29  ;;  %v508_v34 = vmul.f32 %v2805_v27, %v2805_v27 }
 0x254   :  { %v511_v39 = vmul.f32 %v2818_v35, %v2818_v35 }
 0x255   :  { %536 = vadd.xlane.f32.xlu0 %v508_v34  ;;  %v509_v36 = vmul.f32 %v2813_v33, %v2813_v33 }
 0x257   :  { %538 = vadd.xlane.f32.xlu1 %v509_v36 }
 0x259   :  { %540 = vadd.xlane.f32.xlu0 %v510_v38 }
 0x25b   :  { %542 = vadd.xlane.f32.xlu1 %v511_v39 }
 0x2c9   :  { %v517_v49 = vpop.xlane.xlu1 %516 }
 0x2ca   :  { %v546_v50 = vmax.f32 %v517_v49, 1e-24  ;;  %v513_v51 = vpop.xlane.xlu0 %512 }
 0x2cb   :  { %v544_v53 = vmax.f32 %v513_v51, 1e-24 }
 0x2cd   :  { %2303 = vrsqrt.f32 %v544_v53  ;;  %v519_v55 = vpop.xlane.xlu1 %518 }
 0x2ce   :  { %2305 = vrsqrt.f32 %v546_v50  ;;  %v547_v57 = vmax.f32 %v519_v55, 1e-24  ;;  %v515_v58 = vpop.xlane.xlu0 %514 }
 0x2cf   :  { %v545_v60 = vmax.f32 %v515_v58, 1e-24 }
 0x2d0   :  { %2307 = vrsqrt.f32 %v547_v57 }
 0x2d1   :  { %2309 = vrsqrt.f32 %v545_v60 }
 0x2d2   :  { %v521_v61 = vpop.xlane.xlu0 %520 }
 0x2d3   :  { %v548_v62 = vmax.f32 %v521_v61, 1e-24 }
 0x2d4   :  { %v523_v63 = vpop.xlane.xlu1 %522 }
 0x2d5   :  { %2311 = vrsqrt.f32 %v548_v62  ;;  %v549_v0 = vmax.f32 %v523_v63, 1e-24 }
 0x2d6   :  { %v525_v2 = vpop.xlane.xlu0 %524 }
 0x2d7   :  { %v2304_v3 = vpop.eup %2303  ;;  %2313 = vrsqrt.f32 %v549_v0  ;;  %v550_v6 = vmax.f32 %v525_v2, 1e-24 }
 0x2d8   :  { %v2306_v8 = vpop.eup %2305  ;;  %v527_v9 = vpop.xlane.xlu1 %526  ;;  %v576_v14 = vmul.f32 %v2304_v3, %v2750_v54 }
 0x2d9   :  { %2315 = vrsqrt.f32 %v550_v6  ;;  %v551_v10 = vmax.f32 %v527_v9, 1e-24  ;;  %v578_v17 = vmul.f32 %v2306_v8, %v2747_v52 }
 0x2da   :  { %v2308_v11 = vpop.eup %2307  ;;  %v529_v13 = vpop.xlane.xlu0 %528  ;;  %v592_v29 = vmax.f32 %v576_v14, 0.0 }
 0x2db   :  { %v2310_v15 = vpop.eup %2309  ;;  %v579_v20 = vmul.f32 %v2308_v11, %v2753_v56  ;;  %2317 = vrsqrt.f32 %v551_v10  ;;  %v552_v22 = vmax.f32 %v529_v13, 1e-24  ;;  %v594_v34 = vmax.f32 %v578_v17, 0.0 }
 0x2dc   :  { %v531_v23 = vpop.xlane.xlu1 %530  ;;  %v577_v24 = vmul.f32 %v2310_v15, %v2758_v59 }
 0x2dd   :  { %v595_v25 = vmax.f32 %v579_v20, 0.0  ;;  %2319 = vrsqrt.f32 %v552_v22  ;;  %v553_v26 = vmax.f32 %v531_v23, 1e-24 }
 0x2de   :  { %v533_v28 = vpop.xlane.xlu0 %532  ;;  %v593_v30 = vmax.f32 %v577_v24, 0.0 }
 0x2df   :  { %v2312_v31 = vpop.eup %2311  ;;  %2321 = vrsqrt.f32 %v553_v26  ;;  %v554_v54 = vmax.f32 %v533_v28, 1e-24  ;;  %v609_v39 = vpack.c.bf16 %v595_v25, %v594_v34 }
 0x2e0   :  { %v535_v36 = vpop.xlane.xlu1 %534  ;;  %v608_v37 = vpack.c.bf16 %v593_v30, %v592_v29  ;;  %v580_v52 = vmul.f32 %v2312_v31, %v2767_v1 }
 0x2e1   :  { %v2314_v56 = vpop.eup %2313  ;;  %2323 = vrsqrt.f32 %v554_v54  ;;  %v555_v38 = vmax.f32 %v535_v36, 1e-24 }
 0x2e2   :  { %2104 = vmatprep.mubr.bf16.mxu0 %v608_v37  ;;  %v537_v59 = vpop.xlane.xlu0 %536  ;;  %v581_v40 = vmul.f32 %v2314_v56, %v2773_v5  ;;  %v596_v51 = vmax.f32 %v580_v52, 0.0 }
 0x2e3   :  { %v2316_v48 = vpop.eup %2315  ;;  %2325 = vrsqrt.f32 %v555_v38  ;;  %v556_v49 = vmax.f32 %v537_v59, 1e-24  ;;  %2105 = vmatmul.mubr.bf16.vlgmr.msra.gmra.mrb[16].mxu0 %v609_v39 }
 0x2e4   :  { %v539_v50 = vpop.xlane.xlu1 %538  ;;  %v597_v53 = vmax.f32 %v581_v40, 0.0  ;;  %v582_v55 = vmul.f32 %v2316_v48, %v2770_v4 }
 0x2e5   :  { %v2318_v57 = vpop.eup %2317  ;;  %2327 = vrsqrt.f32 %v556_v49  ;;  %v557_v1 = vmax.f32 %v539_v50, 1e-24 }
 0x2e6   :  { %v541_v58 = vpop.xlane.xlu0 %540  ;;  %v610_v60 = vpack.c.bf16 %v597_v53, %v596_v51  ;;  %v583_v61 = vmul.f32 %v2318_v57, %v2778_v7  ;;  %v598_v0 = vmax.f32 %v582_v55, 0.0 }
 0x2e7   :  { %v2320_v62 = vpop.eup %2319  ;;  %2329 = vrsqrt.f32 %v557_v1  ;;  %v558_v63 = vmax.f32 %v541_v58, 1e-24 }
 0x2e8   :  { %v543_v5 = vpop.xlane.xlu1 %542  ;;  %2108 = vmatprep.mubr.bf16.mxu0 %v610_v60  ;;  %v599_v2 = vmax.f32 %v583_v61, 0.0  ;;  %v584_v3 = vmul.f32 %v2320_v62, %v2785_v12 }
 0x2e9   :  { %v2322_v6 = vpop.eup %2321  ;;  %2331 = vrsqrt.f32 %v558_v63  ;;  %v559_v8 = vmax.f32 %v543_v5, 1e-24  ;;  %v2295_v5 = vld [vmem:[#allocation7] sm:$0xff]  }
 0x2ea   :  { %v611_v4 = vpack.c.bf16 %v599_v2, %v598_v0  ;;  %v585_v9 = vmul.f32 %v2322_v6, %v2793_v19  ;;  %v600_v11 = vmax.f32 %v584_v3, 0.0  ;;  %v2296_v0 = vld [vmem:[#allocation7 + $0x8] sm:$0xff]   ;;  %2152 = vmatprep.subr.bf16.mxu0 %v2295_v5 }
 0x2eb   :  { %v2324_v10 = vpop.eup %2323  ;;  %2333 = vrsqrt.f32 %v559_v8  ;;  %2153 = vmatpush3.bf16.msra.mxu0 %v2295_v5 }
 0x2ec   :  { %2109 = vmatmul.mubr.bf16.gmra.mrb[20].mxu0 %v611_v4  ;;  %v601_v7 = vmax.f32 %v585_v9, 0.0  ;;  %v586_v13 = vmul.f32 %v2324_v10, %v2790_v18  ;;  %2154 = vmatprep.subr.bf16.mxu0 %v2296_v0 }
 0x2ed   :  { %v2326_v14 = vpop.eup %2325 }
 0x2ee   :  { %v612_v15 = vpack.c.bf16 %v601_v7, %v600_v11  ;;  %v587_v17 = vmul.f32 %v2326_v14, %v2798_v21  ;;  %v602_v12 = vmax.f32 %v586_v13, 0.0 }
 0x2ef   :  { %v2328_v20 = vpop.eup %2327  ;;  %2155 = vmatpush3.bf16.msra.mxu0 %v2296_v0 }
 0x2f0   :  { %2112 = vmatprep.mubr.bf16.mxu0 %v612_v15  ;;  %v603_v22 = vmax.f32 %v587_v17, 0.0  ;;  %v588_v23 = vmul.f32 %v2328_v20, %v2805_v27 }
 0x2f1   :  { %v2330_v24 = vpop.eup %2329 }
 0x2f2   :  { %v613_v25 = vpack.c.bf16 %v603_v22, %v602_v12  ;;  %v589_v19 = vmul.f32 %v2330_v24, %v2813_v33  ;;  %v604_v28 = vmax.f32 %v588_v23, 0.0 }
 0x2f3   :  { %v2332_v26 = vpop.eup %2331 }
 0x2f4   :  { %2113 = vmatmul.mubr.bf16.gmra.mrb[24].mxu0 %v613_v25  ;;  %v605_v29 = vmax.f32 %v589_v19, 0.0  ;;  %v590_v18 = vmul.f32 %v2332_v26, %v2810_v32 }
 0x2f5   :  { %v2334_v30 = vpop.eup %2333 }
 0x2f6   :  { %v614_v31 = vpack.c.bf16 %v605_v29, %v604_v28  ;;  %v591_v21 = vmul.f32 %v2334_v30, %v2818_v35  ;;  %v606_v34 = vmax.f32 %v590_v18, 0.0  ;;  %v2297_v29 = vld [vmem:[#allocation7 + $0x10] sm:$0xff]  }
 0x2f7   :  { %2156 = vmatprep.subr.bf16.mxu0 %v2297_v29 }
 0x2f8   :  { %2116 = vmatprep.mubr.bf16.mxu0 %v614_v31  ;;  %v607_v54 = vmax.f32 %v591_v21, 0.0  ;;  %2157 = vmatpush3.bf16.msra.mxu0 %v2297_v29 }
 0x2fa   :  { %v615_v36 = vpack.c.bf16 %v607_v54, %v606_v34  ;;  %v2298_v54 = vld [vmem:[#allocation7 + $0x18] sm:$0xff]  }
 0x2fb   :  { %2158 = vmatprep.subr.bf16.mxu0 %v2298_v54 }
 0x2fc   :  { %2117 = vmatmul.mubr.bf16.gmra.mrb[28].mxu0 %v615_v36 }
 0x2fd   :  { %2159 = vmatpush3.bf16.msra.mxu0 %v2298_v54 }
 0x3b6   :  { %v2106_v27 = vpop.f32.mrb[16].mxu0 }
 0x3b7   :  { %v714_v37 = vpop.f32.mrb[17].mxu0 }
 0x3b8   :  { %v2107_v52 = vpop.f32.mrb[18].mxu0 }
 0x3b9   :  { %v779_v56 = vpack.c.bf16 %v2107_v52, %v2106_v27  ;;  %v717_v33 = vpop.f32.mrb[19].mxu0 }
 0x3ba   :  { %v778_v38 = vpack.c.bf16 %v717_v33, %v714_v37 }
 0x3bc   :  { %2120 = vmatprep.subr.bf16.mxu1 %v778_v38 }
 0x3bd   :  { %2121 = vmatpush3.bf16.msra.mxu1 %v778_v38 }
 0x3be   :  { %2122 = vmatprep.subr.bf16.mxu1 %v779_v56 }
 0x3bf   :  { %v2110_v39 = vpop.f32.mrb[20].mxu0 }
 0x3c0   :  { %v730_v32 = vpop.f32.mrb[21].mxu0 }
 0x3c1   :  { %v2111_v59 = vpop.f32.mrb[22].mxu0  ;;  %2123 = vmatpush3.bf16.msra.mxu1 %v779_v56 }
 0x3c2   :  { %v781_v40 = vpack.c.bf16 %v2111_v59, %v2110_v39  ;;  %v733_v35 = vpop.f32.mrb[23].mxu0  ;;  %v2299_v39 = vld [vmem:[#allocation7 + $0x20] sm:$0xff]  }
 0x3c3   :  { %v780_v48 = vpack.c.bf16 %v733_v35, %v730_v32  ;;  %2160 = vmatprep.subr.bf16.mxu0 %v2299_v39 }
 0x3c4   :  { %2161 = vmatpush3.bf16.msra.mxu0 %v2299_v39 }
 0x3c5   :  { %2124 = vmatprep.subr.bf16.mxu1 %v780_v48 }
 0x3c6   :  { %2125 = vmatpush3.bf16.msra.mxu1 %v780_v48 }
 0x3c7   :  { %v2114_v49 = vpop.f32.mrb[24].mxu0  ;;  %2126 = vmatprep.subr.bf16.mxu1 %v781_v40 }
 0x3c8   :  { %v746_v50 = vpop.f32.mrb[25].mxu0 }
 0x3c9   :  { %v2115_v51 = vpop.f32.mrb[26].mxu0 }
 0x3ca   :  { %v783_v53 = vpack.c.bf16 %v2115_v51, %v2114_v49  ;;  %v749_v55 = vpop.f32.mrb[27].mxu0  ;;  %2127 = vmatpush3.bf16.msra.mxu1 %v781_v40  ;;  %v2300_v49 = vld [vmem:[#allocation7 + $0x28] sm:$0xff]  }
 0x3cb   :  { %v782_v57 = vpack.c.bf16 %v749_v55, %v746_v50  ;;  %2162 = vmatprep.subr.bf16.mxu0 %v2300_v49  ;;  %v2302_v55 = vld [vmem:[#allocation7 + $0x38] sm:$0xff]  }
 0x3cc   :  { %2163 = vmatpush3.bf16.msra.mxu0 %v2300_v49 }
 0x3cd   :  { %2128 = vmatprep.subr.bf16.mxu1 %v782_v57 }
 0x3ce   :  { %2129 = vmatpush3.bf16.msra.mxu1 %v782_v57 }
 0x3cf   :  { %v2118_v1 = vpop.f32.mrb[28].mxu0  ;;  %2130 = vmatprep.subr.bf16.mxu1 %v783_v53 }
 0x3d0   :  { %v762_v58 = vpop.f32.mrb[29].mxu0 }
 0x3d1   :  { %v2119_v60 = vpop.f32.mrb[30].mxu0 }
 0x3d2   :  { %v785_v61 = vpack.c.bf16 %v2119_v60, %v2118_v1  ;;  %v765_v62 = vpop.f32.mrb[31].mxu0  ;;  %2131 = vmatpush3.bf16.msra.mxu1 %v783_v53  ;;  %v2301_v53 = vld [vmem:[#allocation7 + $0x30] sm:$0xff]  }
 0x3d3   :  { %v784_v63 = vpack.c.bf16 %v765_v62, %v762_v58  ;;  %2164 = vmatprep.subr.bf16.mxu0 %v2301_v53 }
 0x3d4   :  { %2165 = vmatpush3.bf16.msra.mxu0 %v2301_v53 }
 0x3d5   :  { %2132 = vmatprep.subr.bf16.mxu1 %v784_v63  ;;  %2166 = vmatprep.subr.bf16.mxu0 %v2302_v55 }
 0x3d6   :  { %2133 = vmatpush3.bf16.msra.mxu1 %v784_v63 }
 0x3d7   :  { %2134 = vmatprep.subr.bf16.mxu1 %v785_v61 }
 0x3d8   :  { %2167 = vmatpush3.bf16.msra.mxu0 %v2302_v55 }
 0x3da   :  { %2135 = vmatpush3.bf16.msra.mxu1 %v785_v61 }
 0x3dd   :  { %2137 = vmatmul.mubr.bf16.vlgmr.msra.gmra.mrb[16].mxu1 %v2701_v41  ;;  %v2853_v41 = vld [vmem:[%s3346_s5] ss:$0 sm:$0xff]  ;;  %s2496_s5 = scalar_lea.vmem %s1840_s19, 16 }
 0x3de   :  { %2140 = vmatprep.mubr.bf16.mxu1 %v2706_v42  ;;  %p2497_p4 = scmp.ne.s32.totalorder %s1840_s19, %s2496_s5  ;;  %p2502_p6 = scmp.lt.s32.totalorder %s2500_s21, %s2496_s5 }
 0x3e0   :  { %p2503_p7 = por %p2502_p6, %p2501_p5 }
 0x3e2   :  { %p2504_p8 = pnand %p2503_p7, %p2497_p4 }
 0x3e5   :  { %2141 = vmatmul.mubr.bf16.gmra.mrb[20].mxu1 %v2713_v43 }
 0x3e6   :  { %2144 = vmatprep.mubr.bf16.mxu1 %v2718_v44 }
 0x3ed   :  { %2145 = vmatmul.mubr.bf16.gmra.mrb[24].mxu1 %v2725_v45 }
 0x3ee   :  { %2148 = vmatprep.mubr.bf16.mxu1 %v2730_v46 }
 0x3f5   :  { %2149 = vmatmul.mubr.bf16.gmra.mrb[28].mxu1 %v2737_v47 }
 0x3f6   :  { %2200 = vmatprep.mubr.bf16.mxu1 %v2695_v16 }
 0x4b0   :  { %v2138_v42 = vpop.f32.mrb[16].mxu1 }
 0x4b1   :  { %v826_v43 = vpop.f32.mrb[17].mxu1  ;;  %v2859_v16 = vadd.f32 %v2138_v42, %v2853_v41 }
 0x4b2   :  { %v2856_v44 = vadd.f32 %v2853_v41, %v826_v43  ;;  %v2139_v45 = vpop.f32.mrb[18].mxu1 }
 0x4b3   :  { %v829_v46 = vpop.f32.mrb[19].mxu1  ;;  %v2867_v3 = vadd.f32 %v2139_v45, %v2853_v41  ;;  %v891_v4 = vmul.f32 %v2859_v16, %v2859_v16 }
 0x4b4   :  { %v2862_v47 = vadd.f32 %v2853_v41, %v829_v46  ;;  %v889_v2 = vmul.f32 %v2856_v44, %v2856_v44 }
 0x4b5   :  { %v892_v7 = vmul.f32 %v2867_v3, %v2867_v3 }
 0x4b6   :  { %905 = vadd.xlane.f32.xlu0 %v889_v2  ;;  %v890_v6 = vmul.f32 %v2862_v47, %v2862_v47 }
 0x4b8   :  { %v2142_v8 = vpop.f32.mrb[20].mxu1  ;;  %907 = vadd.xlane.f32.xlu1 %v890_v6 }
 0x4b9   :  { %v842_v9 = vpop.f32.mrb[21].mxu1  ;;  %v2879_v14 = vadd.f32 %v2142_v8, %v2853_v41 }
 0x4ba   :  { %v2874_v10 = vadd.f32 %v2853_v41, %v842_v9  ;;  %v2143_v11 = vpop.f32.mrb[22].mxu1  ;;  %909 = vadd.xlane.f32.xlu0 %v891_v4 }
 0x4bb   :  { %v845_v13 = vpop.f32.mrb[23].mxu1  ;;  %v2887_v20 = vadd.f32 %v2143_v11, %v2853_v41  ;;  %v895_v23 = vmul.f32 %v2879_v14, %v2879_v14 }
 0x4bc   :  { %v2882_v15 = vadd.f32 %v2853_v41, %v845_v13  ;;  %911 = vadd.xlane.f32.xlu1 %v892_v7  ;;  %v893_v17 = vmul.f32 %v2874_v10, %v2874_v10 }
 0x4bd   :  { %v896_v26 = vmul.f32 %v2887_v20, %v2887_v20 }
 0x4be   :  { %913 = vadd.xlane.f32.xlu0 %v893_v17  ;;  %v894_v12 = vmul.f32 %v2882_v15, %v2882_v15 }
 0x4c0   :  { %v2146_v22 = vpop.f32.mrb[24].mxu1  ;;  %915 = vadd.xlane.f32.xlu1 %v894_v12 }
 0x4c1   :  { %v858_v24 = vpop.f32.mrb[25].mxu1  ;;  %v2899_v18 = vadd.f32 %v2146_v22, %v2853_v41 }
 0x4c2   :  { %v2894_v25 = vadd.f32 %v2853_v41, %v858_v24  ;;  %v2147_v19 = vpop.f32.mrb[26].mxu1  ;;  %917 = vadd.xlane.f32.xlu0 %v895_v23 }
 0x4c3   :  { %v861_v28 = vpop.f32.mrb[27].mxu1  ;;  %v2907_v21 = vadd.f32 %v2147_v19, %v2853_v41  ;;  %v899_v27 = vmul.f32 %v2899_v18, %v2899_v18 }
 0x4c4   :  { %v2902_v30 = vadd.f32 %v2853_v41, %v861_v28  ;;  %919 = vadd.xlane.f32.xlu1 %v896_v26  ;;  %v897_v31 = vmul.f32 %v2894_v25, %v2894_v25 }
 0x4c5   :  { %v900_v33 = vmul.f32 %v2907_v21, %v2907_v21 }
 0x4c6   :  { %921 = vadd.xlane.f32.xlu0 %v897_v31  ;;  %v898_v34 = vmul.f32 %v2902_v30, %v2902_v30 }
 0x4c8   :  { %v2150_v36 = vpop.f32.mrb[28].mxu1  ;;  %923 = vadd.xlane.f32.xlu1 %v898_v34 }
 0x4c9   :  { %v874_v37 = vpop.f32.mrb[29].mxu1  ;;  %v2919_v32 = vadd.f32 %v2150_v36, %v2853_v41 }
 0x4ca   :  { %v2914_v52 = vadd.f32 %v2853_v41, %v874_v37  ;;  %v2151_v56 = vpop.f32.mrb[30].mxu1  ;;  %925 = vadd.xlane.f32.xlu0 %v899_v27 }
 0x4cb   :  { %v877_v38 = vpop.f32.mrb[31].mxu1  ;;  %v2927_v35 = vadd.f32 %v2151_v56, %v2853_v41  ;;  %v903_v50 = vmul.f32 %v2919_v32, %v2919_v32 }
 0x4cc   :  { %v2922_v59 = vadd.f32 %v2853_v41, %v877_v38  ;;  %927 = vadd.xlane.f32.xlu1 %v900_v33  ;;  %v901_v40 = vmul.f32 %v2914_v52, %v2914_v52 }
 0x4cd   :  { %v904_v51 = vmul.f32 %v2927_v35, %v2927_v35 }
 0x4ce   :  { %929 = vadd.xlane.f32.xlu0 %v901_v40  ;;  %v902_v48 = vmul.f32 %v2922_v59, %v2922_v59 }
 0x4d0   :  { %931 = vadd.xlane.f32.xlu1 %v902_v48 }
 0x4d2   :  { %933 = vadd.xlane.f32.xlu0 %v903_v50 }
 0x4d4   :  { %935 = vadd.xlane.f32.xlu1 %v904_v51 }
 0x543   :  { %v906_v57 = vpop.xlane.xlu0 %905 }
 0x544   :  { %v937_v1 = vmax.f32 %v906_v57, 1e-24 }
 0x545   :  { %v908_v58 = vpop.xlane.xlu1 %907 }
 0x546   :  { %2335 = vrsqrt.f32 %v937_v1  ;;  %v938_v60 = vmax.f32 %v908_v58, 1e-24 }
 0x547   :  { %v910_v61 = vpop.xlane.xlu0 %909 }
 0x548   :  { %2337 = vrsqrt.f32 %v938_v60  ;;  %v939_v62 = vmax.f32 %v910_v61, 1e-24 }
 0x549   :  { %v912_v63 = vpop.xlane.xlu1 %911 }
 0x54a   :  { %2339 = vrsqrt.f32 %v939_v62  ;;  %v940_v5 = vmax.f32 %v912_v63, 1e-24 }
 0x54b   :  { %v914_v0 = vpop.xlane.xlu0 %913 }
 0x54c   :  { %2341 = vrsqrt.f32 %v940_v5  ;;  %v941_v41 = vmax.f32 %v914_v0, 1e-24 }
 0x54d   :  { %v916_v42 = vpop.xlane.xlu1 %915 }
 0x54e   :  { %2343 = vrsqrt.f32 %v941_v41  ;;  %v942_v43 = vmax.f32 %v916_v42, 1e-24 }
 0x54f   :  { %v918_v45 = vpop.xlane.xlu0 %917 }
 0x550   :  { %v2336_v46 = vpop.eup %2335  ;;  %2345 = vrsqrt.f32 %v942_v43  ;;  %v943_v2 = vmax.f32 %v918_v45, 1e-24 }
 0x551   :  { %v920_v6 = vpop.xlane.xlu1 %919  ;;  %v969_v8 = vmul.f32 %v2336_v46, %v2856_v44 }
 0x552   :  { %v2338_v4 = vpop.eup %2337  ;;  %2347 = vrsqrt.f32 %v943_v2  ;;  %v944_v9 = vmax.f32 %v920_v6, 1e-24 }
 0x553   :  { %v922_v11 = vpop.xlane.xlu0 %921  ;;  %v970_v7 = vmul.f32 %v2338_v4, %v2862_v47  ;;  %v985_v23 = vmax.f32 %v969_v8, 0.0 }
 0x554   :  { %v2340_v13 = vpop.eup %2339  ;;  %2349 = vrsqrt.f32 %v944_v9  ;;  %v945_v17 = vmax.f32 %v922_v11, 1e-24 }
 0x555   :  { %v971_v12 = vmul.f32 %v2340_v13, %v2859_v16  ;;  %v924_v22 = vpop.xlane.xlu1 %923  ;;  %v986_v24 = vmax.f32 %v970_v7, 0.0 }
 0x556   :  { %v2342_v19 = vpop.eup %2341  ;;  %2351 = vrsqrt.f32 %v945_v17  ;;  %v946_v26 = vmax.f32 %v924_v22, 1e-24 }
 0x557   :  { %v972_v28 = vmul.f32 %v2342_v19, %v2867_v3  ;;  %v926_v44 = vpop.xlane.xlu0 %925  ;;  %v1001_v29 = vpack.c.bf16 %v986_v24, %v985_v23  ;;  %v987_v54 = vmax.f32 %v971_v12, 0.0 }
 0x558   :  { %v2344_v31 = vpop.eup %2343  ;;  %2353 = vrsqrt.f32 %v946_v26  ;;  %v947_v34 = vmax.f32 %v926_v44, 1e-24 }
 0x559   :  { %v988_v47 = vmax.f32 %v972_v28, 0.0  ;;  %v928_v36 = vpop.xlane.xlu1 %927  ;;  %2168 = vmatprep.mubr.bf16.mxu0 %v1001_v29  ;;  %v973_v27 = vmul.f32 %v2344_v31, %v2874_v10  ;;  %v2978_v31 = vld [vmem:[%s3349_s8 + $0x18] sm:$0xff] }
 0x55a   :  { %v2346_v16 = vpop.eup %2345  ;;  %2355 = vrsqrt.f32 %v947_v34  ;;  %v948_v37 = vmax.f32 %v928_v36, 1e-24  ;;  %v1440_v34 = vsel %vm1434_vm0, %v2978_v31, 0.0  ;;  %vm1479_vm9 = vcmp.gt.f32.partialorder %v2978_v31, 0.0 }
 0x55b   :  { %v930_v56 = vpop.xlane.xlu0 %929  ;;  %v1002_v33 = vpack.c.bf16 %v988_v47, %v987_v54  ;;  %v974_v38 = vmul.f32 %v2346_v16, %v2882_v15  ;;  %v989_v48 = vmax.f32 %v973_v27, 0.0  ;;  %v1422_v47 = vld [vmem:[%s3349_s8 + $0x20] sm:$0xff]  ;;  %v2990_v16 = vld [vmem:[%s3349_s8 + $0x28] sm:$0xff] }
 0x55c   :  { %v2348_v39 = vpop.eup %2347  ;;  %2357 = vrsqrt.f32 %v948_v37  ;;  %v949_v3 = vmax.f32 %v930_v56, 1e-24  ;;  %v1442_v36 = vsel %vm1434_vm0, %v1422_v47, 0.0  ;;  %v1444_v37 = vsel %vm1434_vm0, %v2990_v16, 0.0 }
 0x55d   :  { %v932_v40 = vpop.xlane.xlu1 %931  ;;  %2169 = vmatmul.mubr.bf16.vlgmr.msra.gmra.mrb[32].mxu0 %v1002_v33  ;;  %v990_v49 = vmax.f32 %v974_v38, 0.0  ;;  %v975_v50 = vmul.f32 %v2348_v39, %v2879_v14  ;;  %v1424_v33 = vld [vmem:[%s3349_s8 + $0x30] sm:$0xff]  ;;  %vm1480_vm3 = vcmp.gt.f32.partialorder %v1422_v47, 0.0  ;;  %vm1481_vm10 = vcmp.gt.f32.partialorder %v2990_v16, 0.0 }
 0x55e   :  { %v2350_v51 = vpop.eup %2349  ;;  %2359 = vrsqrt.f32 %v949_v3  ;;  %v950_v53 = vmax.f32 %v932_v40, 1e-24  ;;  %v1446_v38 = vsel %vm1434_vm0, %v1424_v33, 0.0  ;;  %v3002_v3 = vld [vmem:[%s3349_s8 + $0x38] sm:$0xff]  ;;  %vm1482_vm4 = vcmp.gt.f32.partialorder %v1424_v33, 0.0 }
 0x55f   :  { %v934_v10 = vpop.xlane.xlu0 %933  ;;  %v1003_v55 = vpack.c.bf16 %v990_v49, %v989_v48  ;;  %v976_v57 = vmul.f32 %v2350_v51, %v2887_v20  ;;  %v991_v60 = vmax.f32 %v975_v50, 0.0  ;;  %v1448_v40 = vsel %vm1434_vm0, %v3002_v3, 0.0  ;;  %v3009_v49 = vld [vmem:[%s3349_s8 + $0x40] sm:$0xff]  ;;  %v1427_v50 = vld [vmem:[%s3349_s8 + $0x48] sm:$0xff] }
 0x560   :  { %v2352_v1 = vpop.eup %2351  ;;  %2361 = vrsqrt.f32 %v950_v53  ;;  %v951_v58 = vmax.f32 %v934_v10, 1e-24  ;;  %v1450_v51 = vsel %vm1434_vm0, %v3009_v49, 0.0  ;;  %v3019_v10 = vld [vmem:[%s3349_s8 + $0x50] sm:$0xff]  ;;  %vm1485_vm5 = vcmp.gt.f32.partialorder %v1427_v50, 0.0 }
 0x561   :  { %v936_v15 = vpop.xlane.xlu1 %935  ;;  %2172 = vmatprep.mubr.bf16.mxu0 %v1003_v55  ;;  %v992_v61 = vmax.f32 %v976_v57, 0.0  ;;  %v977_v62 = vmul.f32 %v2352_v1, %v2894_v25  ;;  %v1452_v55 = vsel %vm1434_vm0, %v1427_v50, 0.0  ;;  %v1429_v1 = vld [vmem:[%s3349_s8 + $0x58] sm:$0xff]  ;;  %vm1483_vm11 = vcmp.gt.f32.partialorder %v3002_v3, 0.0 }
 0x562   :  { %v2354_v63 = vpop.eup %2353  ;;  %2363 = vrsqrt.f32 %v951_v58  ;;  %v952_v5 = vmax.f32 %v936_v15, 1e-24  ;;  %v1454_v58 = vsel %vm1434_vm0, %v3019_v10, 0.0  ;;  %vm1487_vm6 = vcmp.gt.f32.partialorder %v1429_v1, 0.0 }
 0x563   :  { %v1004_v14 = vpack.c.bf16 %v992_v61, %v991_v60  ;;  %v978_v0 = vmul.f32 %v2354_v63, %v2902_v30  ;;  %v993_v42 = vmax.f32 %v977_v62, 0.0  ;;  %v1430_v60 = vld [vmem:[%s3349_s8 + $0x60] sm:$0xff]  ;;  %v1456_v61 = vsel %vm1434_vm0, %v1429_v1, 0.0  ;;  %v3035_v63 = vld [vmem:[%s3349_s8 + $0x68] sm:$0xff] }
 0x564   :  { %v2356_v41 = vpop.eup %2355  ;;  %2365 = vrsqrt.f32 %v952_v5  ;;  %v1458_v5 = vsel %vm1434_vm0, %v1430_v60, 0.0  ;;  %vm1488_vm8 = vcmp.gt.f32.partialorder %v1430_v60, 0.0  ;;  %vm1484_vm12 = vcmp.gt.f32.partialorder %v3009_v49, 0.0 }
 0x565   :  { %2173 = vmatmul.mubr.bf16.gmra.mrb[36].mxu0 %v1004_v14  ;;  %v994_v20 = vmax.f32 %v978_v0, 0.0  ;;  %v979_v43 = vmul.f32 %v2356_v41, %v2899_v18  ;;  %v3041_v0 = vld [vmem:[%s3349_s8 + $0x70] sm:$0xff]  ;;  %v1460_v41 = vsel %vm1434_vm0, %v3035_v63, 0.0  ;;  %vm1486_vm13 = vcmp.gt.f32.partialorder %v3019_v10, 0.0 }
 0x566   :  { %v2358_v45 = vpop.eup %2357  ;;  %vm1490_vm14 = vcmp.gt.f32.partialorder %v3041_v0, 0.0  ;;  %vm1489_vm15 = vcmp.gt.f32.partialorder %v3035_v63, 0.0 }
 0x567   :  { %v1005_v46 = vpack.c.bf16 %v994_v20, %v993_v42  ;;  %v980_v2 = vmul.f32 %v2358_v45, %v2907_v21  ;;  %v995_v25 = vmax.f32 %v979_v43, 0.0  ;;  %v3048_v20 = vld [vmem:[%s3349_s8 + $0x78] sm:$0xff]  ;;  %v1462_v43 = vsel %vm1434_vm0, %v3041_v0, 0.0 }
 0x568   :  { %v2360_v6 = vpop.eup %2359 }
 0x569   :  { %2176 = vmatprep.mubr.bf16.mxu0 %v1005_v46  ;;  %v996_v8 = vmax.f32 %v980_v2, 0.0  ;;  %v981_v4 = vmul.f32 %v2360_v6, %v2914_v52  ;;  %v2954_v52 = vld [vmem:[%s3349_s8] sm:$0xff]  ;;  %v1464_v46 = vsel %vm1434_vm0, %v3048_v20, 0.0 }
 0x56a   :  { %v2362_v9 = vpop.eup %2361  ;;  %v1435_v26 = vsel %vm1434_vm0, %v2954_v52, 0.0  ;;  %vm1476_vm1 = vcmp.gt.f32.partialorder %v2954_v52, 0.0 }
 0x56b   :  { %v1006_v11 = vpack.c.bf16 %v996_v8, %v995_v25  ;;  %v982_v30 = vmul.f32 %v2362_v9, %v2922_v59  ;;  %v997_v13 = vmax.f32 %v981_v4, 0.0  ;;  %v2959_v59 = vld [vmem:[%s3349_s8 + $0x8] sm:$0xff] }
 0x56c   :  { %v2364_v7 = vpop.eup %2363  ;;  %v1436_v28 = vsel %vm1434_vm0, %v2959_v59, 0.0  ;;  %vm1477_vm7 = vcmp.gt.f32.partialorder %v2959_v59, 0.0 }
 0x56d   :  { %2177 = vmatmul.mubr.bf16.gmra.mrb[40].mxu0 %v1006_v11  ;;  %v998_v17 = vmax.f32 %v982_v30, 0.0  ;;  %v983_v18 = vmul.f32 %v2364_v7, %v2919_v32  ;;  %v2964_v32 = vld [vmem:[%s3349_s8 + $0x10] sm:$0xff]  ;;  %v1437_v29 = vadd.f32 %v1436_v28, %v1435_v26 }
 0x56e   :  { %v2366_v12 = vpop.eup %2365  ;;  %v1438_v44 = vsel %vm1434_vm0, %v2964_v32, 0.0  ;;  %vm1478_vm2 = vcmp.gt.f32.partialorder %v2964_v32, 0.0  ;;  %vm1491_vm0 = vcmp.gt.f32.partialorder %v3048_v20, 0.0 }
 0x56f   :  { %v1007_v22 = vpack.c.bf16 %v998_v17, %v997_v13  ;;  %v984_v21 = vmul.f32 %v2366_v12, %v2927_v35  ;;  %v999_v23 = vmax.f32 %v983_v18, 0.0  ;;  %v2534_v35 = vmov 0  }
 0x570   :  { %2261 = vset.pattern.permute.xlu1 %v2534_v35  ;;  %2262 = vset.pattern.permute.xlu0 %v2534_v35  ;;  %v1439_v54 = vadd.f32 %v1438_v44, %v1437_v29  ;;  %v1492_v25 = vsel %vm1476_vm1, 1, %v2534_v35  ;;  %v1494_v8 = vsel %vm1478_vm2, 1, %v2534_v35  ;;  %v1496_v4 = vsel %vm1480_vm3, 1, %v2534_v35 }
 0x571   :  { %2180 = vmatprep.mubr.bf16.mxu0 %v1007_v22  ;;  %v1000_v24 = vmax.f32 %v984_v21, 0.0  ;;  %1611 = vperm.xlu1 %2261, %v2954_v52   ;;  %v1498_v9 = vsel %vm1482_vm4, 1, %v2534_v35  ;;  %v1501_v11 = vsel %vm1485_vm5, 1, %v2534_v35  ;;  %v1503_v30 = vsel %vm1487_vm6, 1, %v2534_v35 }
 0x572   :  { %v1441_v27 = vadd.f32 %v1440_v34, %v1439_v54  ;;  %v1493_v7 = vsel %vm1477_vm7, 1, %v2534_v35  ;;  %v1504_v18 = vsel %vm1488_vm8, 1, %v2534_v35  ;;  %v1495_v12 = vsel %vm1479_vm9, 1, %v2534_v35 }
 0x573   :  { %v1008_v19 = vpack.c.bf16 %v1000_v24, %v999_v23 }
 0x574   :  { %v1443_v56 = vadd.f32 %v1442_v36, %v1441_v27 }
 0x575   :  { %2181 = vmatmul.mubr.bf16.gmra.mrb[44].mxu0 %v1008_v19  ;;  %1621 = vperm.xlu1 %2261, %v2964_v32   ;;  %v1497_v19 = vsel %vm1481_vm10, 1, %v2534_v35  ;;  %v1499_v32 = vsel %vm1483_vm11, 1, %v2534_v35 }
 0x576   :  { %v1445_v39 = vadd.f32 %v1444_v37, %v1443_v56 }
 0x578   :  { %v1447_v48 = vadd.f32 %v1446_v38, %v1445_v39 }
 0x579   :  { %1626 = vperm.xlu1 %2261, %v2978_v31   ;;  %v1500_v31 = vsel %vm1484_vm12, 1, %v2534_v35 }
 0x57a   :  { %v1449_v53 = vadd.f32 %v1448_v40, %v1447_v48  ;;  %v2401_v48 = vld [vmem:[%s3341_s0 + $0x8] sm:$0xff]  }
 0x57c   :  { %v1451_v57 = vadd.f32 %v1450_v51, %v1449_v53  ;;  %v2404_v51 = vld [vmem:[%s3341_s0 + $0x20] sm:$0xff]   ;;  %v2405_v53 = vld [vmem:[%s3341_s0 + $0x28] sm:$0xff]  }
 0x57d   :  { %1631 = vperm.xlu1 %2261, %v1422_v47   ;;  %v1502_v47 = vsel %vm1486_vm13, 1, %v2534_v35 }
 0x57e   :  { %v1453_v15 = vadd.f32 %v1452_v55, %v1451_v57  ;;  %v2407_v55 = vld [vmem:[%s3341_s0 + $0x38] sm:$0xff]  }
 0x580   :  { %v1455_v62 = vadd.f32 %v1454_v58, %v1453_v15 }
 0x581   :  { %1636 = vperm.xlu1 %2261, %v2990_v16  }
 0x582   :  { %v1457_v14 = vadd.f32 %v1456_v61, %v1455_v62 }
 0x584   :  { %v1459_v42 = vadd.f32 %v1458_v5, %v1457_v14  ;;  %v1892_v5 = vld [vmem:[%s3348_s7] ss:$0 sm:$0xff]  ;;  %s2535_s7 = smov 1.0  }
 0x585   :  { %1641 = vperm.xlu1 %2261, %v1424_v33  }
 0x586   :  { %v1461_v45 = vadd.f32 %v1460_v41, %v1459_v42 }
 0x588   :  { %v1463_v2 = vadd.f32 %v1462_v43, %v1461_v45 }
 0x589   :  { %1646 = vperm.xlu1 %2261, %v3002_v3  }
 0x58a   :  { %v1465_v6 = vadd.f32 %v1464_v46, %v1463_v2 }
 0x58c   :  { %1466 = vadd.xlane.f32.xlu0 %v1465_v6 }
 0x58d   :  { %1651 = vperm.xlu1 %2261, %v3009_v49   ;;  %v2402_v49 = vld [vmem:[%s3341_s0 + $0x10] sm:$0xff]  }
 0x591   :  { %1656 = vperm.xlu1 %2261, %v1427_v50   ;;  %v2403_v50 = vld [vmem:[%s3341_s0 + $0x18] sm:$0xff]  }
 0x595   :  { %1666 = vperm.xlu1 %2261, %v1429_v1  }
 0x599   :  { %1509 = vperm.xlu1 %2261, %v1492_v25  }
 0x59d   :  { %1515 = vperm.xlu1 %2261, %v1494_v8  }
 0x5a1   :  { %1521 = vperm.xlu1 %2261, %v1496_v4  }
 0x5a2   :  { %1616 = vperm.xlu0 %2262, %v2959_v59  }
 0x5a5   :  { %1527 = vperm.xlu1 %2261, %v1498_v9  }
 0x5a6   :  { %1661 = vperm.xlu0 %2262, %v3019_v10   ;;  %v2406_v10 = vld [vmem:[%s3341_s0 + $0x30] sm:$0xff]  }
 0x5a9   :  { %1676 = vperm.xlu1 %2261, %v3035_v63   ;;  %v1746_v63 = vld [vmem:[#allocation8 + $0x88] sm:$0xff] }
 0x5aa   :  { %1671 = vperm.xlu0 %2262, %v1430_v60  }
 0x5ad   :  { %1536 = vperm.xlu1 %2261, %v1501_v11  }
 0x5ae   :  { %1512 = vperm.xlu0 %2262, %v1493_v7  }
 0x5b1   :  { %1542 = vperm.xlu1 %2261, %v1503_v30  }
 0x5b2   :  { %1518 = vperm.xlu0 %2262, %v1495_v12  }
 0x5b5   :  { %1545 = vperm.xlu1 %2261, %v1504_v18  }
 0x5b6   :  { %1524 = vperm.xlu0 %2262, %v1497_v19  }
 0x5ba   :  { %1530 = vperm.xlu0 %2262, %v1499_v32  }
 0x5be   :  { %1533 = vperm.xlu0 %2262, %v1500_v31  }
 0x5c2   :  { %1539 = vperm.xlu0 %2262, %v1502_v47  }
 0x5c6   :  { %1681 = vperm.xlu0 %2262, %v3041_v0   ;;  %v1507_v0 = vsel %vm1491_vm0, 1, %v2534_v35 }
 0x619   :  { %v1467_v57 = vpop.xlane.xlu0 %1466 }
 0x61a   :  { %v1468_v1 = vrot.slane %v1467_v57, 4 }
 0x61c   :  { %v1469_v58 = vadd.f32 %v1468_v1, %v1467_v57  ;;  %v1505_v57 = vsel %vm1489_vm15, 1, %v2534_v35 }
 0x61e   :  { %v1470_v15 = vrot.slane %v1469_v58, 2 }
 0x620   :  { %v1471_v60 = vadd.f32 %v1470_v15, %v1469_v58 }
 0x622   :  { %v1472_v61 = vrot.slane %v1471_v60, 1 }
 0x624   :  { %v1473_v62 = vadd.f32 %v1472_v61, %v1471_v60  ;;  %v1745_v60 = vld [vmem:[#allocation8 + $0x80] sm:$0xff] }
 0x625   :  { %v2216_v61 = vpack.c.bf16 %v1746_v63, %v1745_v60  ;;  %v1741_v63 = vld [vmem:[#allocation8 + $0x60] sm:$0xff] }
 0x626   :  { %2248 = vpush %v1473_v62  ;;  %v1729_v62 = vld [vmem:[#allocation8] sm:$0xff] }
 0x627   :  { %2217 = vmatprep.subr.bf16.mxu0 %v2216_v61  ;;  %v1742_v61 = vld [vmem:[#allocation8 + $0x68] sm:$0xff] }
 0x630   :  { %v2170_v13 = vpop.f32.mrb[32].mxu0 }
 0x631   :  { %v1107_v17 = vpop.f32.mrb[33].mxu0 }
 0x632   :  { %v2171_v22 = vpop.f32.mrb[34].mxu0 }
 0x633   :  { %v1172_v21 = vpack.c.bf16 %v2171_v22, %v2170_v13  ;;  %v1110_v23 = vpop.f32.mrb[35].mxu0 }
 0x634   :  { %v1171_v24 = vpack.c.bf16 %v1110_v23, %v1107_v17 }
 0x636   :  { %2184 = vmatprep.subr.bf16.mxu1 %v1171_v24 }
 0x637   :  { %2185 = vmatpush3.bf16.msra.mxu1 %v1171_v24 }
 0x638   :  { %v2174_v52 = vpop.f32.mrb[36].mxu0  ;;  %2186 = vmatprep.subr.bf16.mxu1 %v1172_v21 }
 0x639   :  { %v1123_v59 = vpop.f32.mrb[37].mxu0 }
 0x63a   :  { %v2175_v26 = vpop.f32.mrb[38].mxu0 }
 0x63b   :  { %v1174_v28 = vpack.c.bf16 %v2175_v26, %v2174_v52  ;;  %v1126_v44 = vpop.f32.mrb[39].mxu0  ;;  %2187 = vmatpush3.bf16.msra.mxu1 %v1172_v21 }
 0x63c   :  { %v1173_v29 = vpack.c.bf16 %v1126_v44, %v1123_v59 }
 0x63e   :  { %2188 = vmatprep.subr.bf16.mxu1 %v1173_v29 }
 0x63f   :  { %2189 = vmatpush3.bf16.msra.mxu1 %v1173_v29 }
 0x640   :  { %v2178_v34 = vpop.f32.mrb[40].mxu0  ;;  %2190 = vmatprep.subr.bf16.mxu1 %v1174_v28 }
 0x641   :  { %v1139_v54 = vpop.f32.mrb[41].mxu0 }
 0x642   :  { %v2179_v36 = vpop.f32.mrb[42].mxu0 }
 0x643   :  { %v1176_v27 = vpack.c.bf16 %v2179_v36, %v2178_v34  ;;  %v1142_v16 = vpop.f32.mrb[43].mxu0  ;;  %2191 = vmatpush3.bf16.msra.mxu1 %v1174_v28 }
 0x644   :  { %v1175_v37 = vpack.c.bf16 %v1142_v16, %v1139_v54 }
 0x646   :  { %2192 = vmatprep.subr.bf16.mxu1 %v1175_v37 }
 0x647   :  { %2193 = vmatpush3.bf16.msra.mxu1 %v1175_v37 }
 0x648   :  { %v2182_v56 = vpop.f32.mrb[44].mxu0  ;;  %2194 = vmatprep.subr.bf16.mxu1 %v1176_v27 }
 0x649   :  { %v1155_v33 = vpop.f32.mrb[45].mxu0 }
 0x64a   :  { %v2183_v38 = vpop.f32.mrb[46].mxu0 }
 0x64b   :  { %v1178_v39 = vpack.c.bf16 %v2183_v38, %v2182_v56  ;;  %v1158_v3 = vpop.f32.mrb[47].mxu0  ;;  %2195 = vmatpush3.bf16.msra.mxu1 %v1176_v27 }
 0x64c   :  { %v1177_v40 = vpack.c.bf16 %v1158_v3, %v1155_v33 }
 0x64e   :  { %2196 = vmatprep.subr.bf16.mxu1 %v1177_v40 }
 0x64f   :  { %2197 = vmatpush3.bf16.msra.mxu1 %v1177_v40 }
 0x650   :  { %2198 = vmatprep.subr.bf16.mxu1 %v1178_v39 }
 0x653   :  { %2199 = vmatpush3.bf16.msra.mxu1 %v1178_v39 }
 0x656   :  { %2201 = vmatmul.mubr.bf16.vlgmr.msra.gmra.mrb[32].mxu1 %v2401_v48 }
 0x657   :  { %2204 = vmatprep.mubr.bf16.mxu1 %v2402_v49  ;;  %s2249_s0 = spop %2248 }
 0x658   :  { %s1475_s17 = smax.f32 %s2535_s7, %s2249_s0 }
 0x65e   :  { %2205 = vmatmul.mubr.bf16.gmra.mrb[36].mxu1 %v2403_v50 }
 0x65f   :  { %2208 = vmatprep.mubr.bf16.mxu1 %v2404_v51  ;;  %v3169_v51 = vpop.permute.xlu1 %1611 }
 0x666   :  { %2209 = vmatmul.mubr.bf16.gmra.mrb[40].mxu1 %v2405_v53  ;;  %v3172_v53 = vpop.permute.xlu1 %1621 }
 0x667   :  { %2212 = vmatprep.mubr.bf16.mxu1 %v2406_v10  ;;  %v1506_v10 = vsel %vm1490_vm14, 1, %v2534_v35 }
 0x66e   :  { %2213 = vmatmul.mubr.bf16.gmra.mrb[44].mxu1 %v2407_v55  ;;  %v3176_v55 = vpop.permute.xlu1 %1626 }
 0x672   :  { %v3181_v1 = vpop.permute.xlu1 %1631 }
 0x676   :  { %v3184_v58 = vpop.permute.xlu1 %1636 }
 0x67a   :  { %v3186_v15 = vpop.permute.xlu1 %1641 }
 0x729   :  { %v2202_v14 = vpop.f32.mrb[32].mxu1 }
 0x72a   :  { %v3105_v41 = vadd.f32 %v2202_v14, %v1892_v5  ;;  %v1219_v42 = vpop.f32.mrb[33].mxu1 }
 0x72b   :  { %v2203_v43 = vpop.f32.mrb[34].mxu1  ;;  %v3107_v45 = vadd.f32 %v1892_v5, %v1219_v42  ;;  %v1747_v42 = vld [vmem:[#allocation8 + $0x90] sm:$0xff] }
 0x72c   :  { %v3109_v46 = vadd.f32 %v2203_v43, %v1892_v5  ;;  %v1222_v2 = vpop.f32.mrb[35].mxu1  ;;  %v1284_v6 = vmul.f32 %v3105_v41, %v3105_v41 }
 0x72d   :  { %v3113_v25 = vadd.f32 %v1892_v5, %v1222_v2  ;;  %v1282_v4 = vmul.f32 %v3107_v45, %v3107_v45  ;;  %v1731_v2 = vld [vmem:[#allocation8 + $0x10] sm:$0xff] }
 0x72e   :  { %1302 = vadd.xlane.f32.xlu1 %v1284_v6  ;;  %v1285_v8 = vmul.f32 %v3109_v46, %v3109_v46  ;;  %v1732_v6 = vld [vmem:[#allocation8 + $0x18] sm:$0xff] }
 0x72f   :  { %v1283_v7 = vmul.f32 %v3113_v25, %v3113_v25  ;;  %v2222_v35 = vpack.c.bf16 %v1732_v6, %v1731_v2  ;;  %v1744_v2 = vld [vmem:[#allocation8 + $0x78] sm:$0xff] }
 0x730   :  { %1304 = vadd.xlane.f32.xlu0 %v1285_v8  ;;  %v3188_v8 = vpop.permute.xlu1 %1646 }
 0x731   :  { %v2206_v9 = vpop.f32.mrb[36].mxu1 }
 0x732   :  { %v3119_v11 = vadd.f32 %v2206_v9, %v1892_v5  ;;  %v1235_v30 = vpop.f32.mrb[37].mxu1  ;;  %1298 = vadd.xlane.f32.xlu1 %v1282_v4  ;;  %v1749_v4 = vld [vmem:[#allocation8 + $0xa0] sm:$0xff]  ;;  %v1750_v9 = vld [vmem:[#allocation8 + $0xa8] sm:$0xff] }
 0x733   :  { %v2207_v13 = vpop.f32.mrb[38].mxu1  ;;  %v3123_v17 = vadd.f32 %v1892_v5, %v1235_v30  ;;  %v2224_v30 = vpack.c.bf16 %v1750_v9, %v1749_v4 }
 0x734   :  { %v3125_v18 = vadd.f32 %v2207_v13, %v1892_v5  ;;  %v1238_v12 = vpop.f32.mrb[39].mxu1  ;;  %1300 = vadd.xlane.f32.xlu0 %v1283_v7  ;;  %v1288_v22 = vmul.f32 %v3119_v11, %v3119_v11  ;;  %v1733_v7 = vld [vmem:[#allocation8 + $0x20] sm:$0xff]  ;;  %v1734_v13 = vld [vmem:[#allocation8 + $0x28] sm:$0xff] }
 0x735   :  { %v3129_v21 = vadd.f32 %v1892_v5, %v1238_v12  ;;  %v1286_v24 = vmul.f32 %v3123_v17, %v3123_v17  ;;  %v2226_v12 = vpack.c.bf16 %v1734_v13, %v1733_v7 }
 0x736   :  { %1310 = vadd.xlane.f32.xlu1 %v1288_v22  ;;  %v1289_v23 = vmul.f32 %v3125_v18, %v3125_v18  ;;  %v3190_v22 = vpop.permute.xlu1 %1651 }
 0x737   :  { %v1287_v32 = vmul.f32 %v3129_v21, %v3129_v21 }
 0x738   :  { %1312 = vadd.xlane.f32.xlu0 %v1289_v23  ;;  %v1751_v23 = vld [vmem:[#allocation8 + $0xb0] sm:$0xff] }
 0x739   :  { %v2210_v19 = vpop.f32.mrb[40].mxu1 }
 0x73a   :  { %v3135_v52 = vadd.f32 %v2210_v19, %v1892_v5  ;;  %v1251_v59 = vpop.f32.mrb[41].mxu1  ;;  %1306 = vadd.xlane.f32.xlu1 %v1286_v24  ;;  %v1752_v24 = vld [vmem:[#allocation8 + $0xb8] sm:$0xff] }
 0x73b   :  { %v2211_v26 = vpop.f32.mrb[42].mxu1  ;;  %v3139_v28 = vadd.f32 %v1892_v5, %v1251_v59  ;;  %v2228_v19 = vpack.c.bf16 %v1752_v24, %v1751_v23  ;;  %v1735_v59 = vld [vmem:[#allocation8 + $0x30] sm:$0xff] }
 0x73c   :  { %v3141_v44 = vadd.f32 %v2211_v26, %v1892_v5  ;;  %v1254_v29 = vpop.f32.mrb[43].mxu1  ;;  %1308 = vadd.xlane.f32.xlu0 %v1287_v32  ;;  %v1292_v31 = vmul.f32 %v3135_v52, %v3135_v52  ;;  %v1736_v32 = vld [vmem:[#allocation8 + $0x38] sm:$0xff] }
 0x73d   :  { %v3145_v34 = vadd.f32 %v1892_v5, %v1254_v29  ;;  %v1290_v47 = vmul.f32 %v3139_v28, %v3139_v28  ;;  %v2230_v26 = vpack.c.bf16 %v1736_v32, %v1735_v59  ;;  %v1753_v29 = vld [vmem:[#allocation8 + $0xc0] sm:$0xff] }
 0x73e   :  { %1318 = vadd.xlane.f32.xlu1 %v1292_v31  ;;  %v1293_v54 = vmul.f32 %v3141_v44, %v3141_v44  ;;  %v1754_v31 = vld [vmem:[#allocation8 + $0xc8] sm:$0xff] }
 0x73f   :  { %v1291_v37 = vmul.f32 %v3145_v34, %v3145_v34 }
 0x740   :  { %1320 = vadd.xlane.f32.xlu0 %v1293_v54  ;;  %v2232_v54 = vpack.c.bf16 %v1754_v31, %v1753_v29 }
 0x741   :  { %v2214_v36 = vpop.f32.mrb[44].mxu1 }
 0x742   :  { %v3151_v27 = vadd.f32 %v2214_v36, %v1892_v5  ;;  %v1267_v16 = vpop.f32.mrb[45].mxu1  ;;  %1314 = vadd.xlane.f32.xlu1 %v1290_v47  ;;  %v1737_v47 = vld [vmem:[#allocation8 + $0x40] sm:$0xff]  ;;  %v1738_v36 = vld [vmem:[#allocation8 + $0x48] sm:$0xff] }
 0x743   :  { %v2215_v56 = vpop.f32.mrb[46].mxu1  ;;  %v3155_v33 = vadd.f32 %v1892_v5, %v1267_v16  ;;  %v1755_v16 = vld [vmem:[#allocation8 + $0xd0] sm:$0xff] }
 0x744   :  { %v3157_v38 = vadd.f32 %v2215_v56, %v1892_v5  ;;  %v1270_v39 = vpop.f32.mrb[47].mxu1  ;;  %1316 = vadd.xlane.f32.xlu0 %v1291_v37  ;;  %v1296_v3 = vmul.f32 %v3151_v27, %v3151_v27  ;;  %v3192_v37 = vpop.permute.xlu1 %1656  ;;  %v2234_v56 = vpack.c.bf16 %v1738_v36, %v1737_v47 }
 0x745   :  { %v3161_v40 = vadd.f32 %v1892_v5, %v1270_v39  ;;  %v1294_v49 = vmul.f32 %v3155_v33, %v3155_v33  ;;  %v1730_v5 = vld [vmem:[#allocation8 + $0x8] sm:$0xff]  ;;  %v1756_v39 = vld [vmem:[#allocation8 + $0xd8] sm:$0xff] }
 0x746   :  { %1326 = vadd.xlane.f32.xlu1 %v1296_v3  ;;  %v1297_v48 = vmul.f32 %v3157_v38, %v3157_v38  ;;  %v2218_v14 = vpack.c.bf16 %v1730_v5, %v1729_v62  ;;  %v1739_v3 = vld [vmem:[#allocation8 + $0x50] sm:$0xff]  ;;  %v1760_v5 = vld [vmem:[#allocation8 + $0xf8] sm:$0xff] }
 0x747   :  { %v1295_v50 = vmul.f32 %v3161_v40, %v3161_v40  ;;  %v1759_v62 = vld [vmem:[#allocation8 + $0xf0] sm:$0xff] }
 0x748   :  { %1328 = vadd.xlane.f32.xlu0 %v1297_v48  ;;  %2219 = vmatpush3.bf16.msra.mxu0 %v2218_v14  ;;  %v1740_v48 = vld [vmem:[#allocation8 + $0x58] sm:$0xff]  ;;  %v3196_v14 = vpop.permute.xlu1 %1666 }
 0x74a   :  { %1322 = vadd.xlane.f32.xlu1 %v1294_v49  ;;  %v2236_v49 = vpack.c.bf16 %v1756_v39, %v1755_v16 }
 0x74c   :  { %1324 = vadd.xlane.f32.xlu0 %v1295_v50  ;;  %v1757_v50 = vld [vmem:[#allocation8 + $0xe0] sm:$0xff]  ;;  %v3200_v4 = vpop.permute.xlu1 %1509 }
 0x74d   :  { %vm1556_vm2 = vcmp.eq.s32.totalorder %v3200_v4, 1 }
 0x75b   :  { %1551 = vperm.xlu1 %2261, %v1506_v10   ;;  %v1758_v10 = vld [vmem:[#allocation8 + $0xe8] sm:$0xff] }
 0x75c   :  { %v2240_v60 = vpack.c.bf16 %v1758_v10, %v1757_v50 }
 0x75f   :  { %1686 = vperm.xlu1 %2261, %v3048_v20   ;;  %v1748_v20 = vld [vmem:[#allocation8 + $0x98] sm:$0xff] }
 0x760   :  { %v2220_v43 = vpack.c.bf16 %v1748_v20, %v1747_v42  ;;  %v2242_v42 = vpack.c.bf16 %v1742_v61, %v1741_v63  ;;  %v2244_v20 = vpack.c.bf16 %v1760_v5, %v1759_v62 }
 0x762   :  { %1548 = vperm.xlu0 %2262, %v1505_v57   ;;  %2221 = vmatprep.subr.bf16.mxu0 %v2220_v43  ;;  %v3194_v57 = vpop.permute.xlu0 %1616  ;;  %v1743_v43 = vld [vmem:[#allocation8 + $0x70] sm:$0xff] }
 0x763   :  { %2223 = vmatpush3.bf16.msra.mxu0 %v2222_v35  ;;  %v2246_v35 = vpack.c.bf16 %v1744_v2, %v1743_v43 }
 0x764   :  { %2225 = vmatprep.subr.bf16.mxu0 %v2224_v30  ;;  %v3204_v30 = vpop.permute.xlu1 %1515 }
 0x765   :  { %vm1558_vm1 = vcmp.eq.s32.totalorder %v3204_v30, 1 }
 0x766   :  { %1554 = vperm.xlu0 %2262, %v1507_v0   ;;  %v2238_v0 = vpack.c.bf16 %v1740_v48, %v1739_v3  ;;  %v3198_v6 = vpop.permute.xlu0 %1661 }
 0x767   :  { %2227 = vmatpush3.bf16.msra.mxu0 %v2226_v12 }
 0x768   :  { %2229 = vmatprep.subr.bf16.mxu0 %v2228_v19  ;;  %v3208_v13 = vpop.permute.xlu1 %1521 }
 0x769   :  { %vm1560_vm5 = vcmp.eq.s32.totalorder %v3208_v13, 1 }
 0x76a   :  { %v3202_v9 = vpop.permute.xlu0 %1671 }
 0x76b   :  { %2231 = vmatpush3.bf16.msra.mxu0 %v2230_v26 }
 0x76c   :  { %2233 = vmatprep.subr.bf16.mxu0 %v2232_v54  ;;  %v3212_v23 = vpop.permute.xlu1 %1527 }
 0x76d   :  { %vm1562_vm3 = vcmp.eq.s32.totalorder %v3212_v23, 1 }
 0x76e   :  { %v3206_v7 = vpop.permute.xlu0 %1512 }
 0x76f   :  { %2235 = vmatpush3.bf16.msra.mxu0 %v2234_v56  ;;  %vm1557_vm6 = vcmp.eq.s32.totalorder %v3206_v7, 1 }
 0x770   :  { %2237 = vmatprep.subr.bf16.mxu0 %v2236_v49  ;;  %v3216_v19 = vpop.permute.xlu1 %1676 }
 0x772   :  { %v3210_v12 = vpop.permute.xlu0 %1518 }
 0x773   :  { %2239 = vmatpush3.bf16.msra.mxu0 %v2238_v0  ;;  %vm1559_vm4 = vcmp.eq.s32.totalorder %v3210_v12, 1 }
 0x774   :  { %2241 = vmatprep.subr.bf16.mxu0 %v2240_v60  ;;  %v3220_v32 = vpop.permute.xlu1 %1536 }
 0x775   :  { %vm1565_vm11 = vcmp.eq.s32.totalorder %v3220_v32, 1 }
 0x776   :  { %v3214_v24 = vpop.permute.xlu0 %1524 }
 0x777   :  { %2243 = vmatpush3.bf16.msra.mxu0 %v2242_v42  ;;  %vm1561_vm7 = vcmp.eq.s32.totalorder %v3214_v24, 1 }
 0x778   :  { %2245 = vmatprep.subr.bf16.mxu0 %v2244_v20  ;;  %v3224_v29 = vpop.permute.xlu1 %1542 }
 0x779   :  { %vm1567_vm10 = vcmp.eq.s32.totalorder %v3224_v29, 1 }
 0x77a   :  { %v3218_v59 = vpop.permute.xlu0 %1530 }
 0x77b   :  { %2247 = vmatpush3.bf16.msra.mxu0 %v2246_v35  ;;  %vm1563_vm8 = vcmp.eq.s32.totalorder %v3218_v59, 1 }
 0x77c   :  { %v3228_v54 = vpop.permute.xlu1 %1545 }
 0x77d   :  { %vm1568_vm15 = vcmp.eq.s32.totalorder %v3228_v54, 1 }
 0x77e   :  { %v3222_v26 = vpop.permute.xlu0 %1533 }
 0x77f   :  { %vm1564_vm12 = vcmp.eq.s32.totalorder %v3222_v26, 1 }
 0x782   :  { %v3226_v31 = vpop.permute.xlu0 %1539 }
 0x783   :  { %vm1566_vm9 = vcmp.eq.s32.totalorder %v3226_v31, 1 }
 0x786   :  { %v3230_v47 = vpop.permute.xlu0 %1681 }
 0x7bb   :  { %v1303_v36 = vpop.xlane.xlu1 %1302 }
 0x7bc   :  { %v1332_v16 = vmax.f32 %v1303_v36, 1e-24 }
 0x7bd   :  { %v1305_v56 = vpop.xlane.xlu0 %1304 }
 0x7be   :  { %v1333_v39 = vmax.f32 %v1305_v56, 1e-24  ;;  %2367 = vrsqrt.f32 %v1332_v16 }
 0x7bf   :  { %v1299_v3 = vpop.xlane.xlu1 %1298 }
 0x7c0   :  { %2369 = vrsqrt.f32 %v1333_v39  ;;  %v1330_v48 = vmax.f32 %v1299_v3, 1e-24 }
 0x7c1   :  { %v1301_v49 = vpop.xlane.xlu0 %1300 }
 0x7c2   :  { %2371 = vrsqrt.f32 %v1330_v48  ;;  %v1331_v50 = vmax.f32 %v1301_v49, 1e-24 }
 0x7c3   :  { %v1311_v10 = vpop.xlane.xlu1 %1310 }
 0x7c4   :  { %2373 = vrsqrt.f32 %v1331_v50  ;;  %v1336_v0 = vmax.f32 %v1311_v10, 1e-24 }
 0x7c5   :  { %v1313_v60 = vpop.xlane.xlu0 %1312 }
 0x7c6   :  { %2375 = vrsqrt.f32 %v1336_v0  ;;  %v1337_v63 = vmax.f32 %v1313_v60, 1e-24 }
 0x7c7   :  { %v1307_v61 = vpop.xlane.xlu1 %1306 }
 0x7c8   :  { %2377 = vrsqrt.f32 %v1337_v63  ;;  %v1334_v62 = vmax.f32 %v1307_v61, 1e-24  ;;  %v2368_v5 = vpop.eup %2367 }
 0x7c9   :  { %v1309_v42 = vpop.xlane.xlu0 %1308  ;;  %v1364_v56 = vmul.f32 %v2368_v5, %v3105_v41 }
 0x7ca   :  { %v2370_v20 = vpop.eup %2369  ;;  %2379 = vrsqrt.f32 %v1334_v62  ;;  %v1335_v43 = vmax.f32 %v1309_v42, 1e-24 }
 0x7cb   :  { %v1365_v2 = vmul.f32 %v2370_v20, %v3109_v46  ;;  %v1319_v35 = vpop.xlane.xlu1 %1318  ;;  %v1380_v46 = vmax.f32 %v1364_v56, 0.0 }
 0x7cc   :  { %v2372_v36 = vpop.eup %2371  ;;  %2381 = vrsqrt.f32 %v1335_v43  ;;  %v1340_v16 = vmax.f32 %v1319_v35, 1e-24 }
 0x7cd   :  { %v1362_v39 = vmul.f32 %v2372_v36, %v3107_v45  ;;  %v1321_v3 = vpop.xlane.xlu0 %1320  ;;  %v1381_v50 = vmax.f32 %v1365_v2, 0.0 }
 0x7ce   :  { %v2374_v48 = vpop.eup %2373  ;;  %2383 = vrsqrt.f32 %v1340_v16  ;;  %v1341_v49 = vmax.f32 %v1321_v3, 1e-24 }
 0x7cf   :  { %v1363_v10 = vmul.f32 %v2374_v48, %v3113_v25  ;;  %v1315_v0 = vpop.xlane.xlu1 %1314  ;;  %v1378_v61 = vmax.f32 %v1362_v39, 0.0  ;;  %v3237_v5 = vpack.c.bf16 %v1381_v50, %v1380_v46 }
 0x7d0   :  { %v2376_v60 = vpop.eup %2375  ;;  %2385 = vrsqrt.f32 %v1341_v49  ;;  %v1338_v63 = vmax.f32 %v1315_v0, 1e-24 }
 0x7d1   :  { %v1379_v62 = vmax.f32 %v1363_v10, 0.0  ;;  %v1368_v42 = vmul.f32 %v2376_v60, %v3119_v11  ;;  %v1317_v20 = vpop.xlane.xlu0 %1316  ;;  %v1404_v60 = vunpack.c.l.bf16 %v3237_v5 }
 0x7d2   :  { %v2378_v41 = vpop.eup %2377  ;;  %2387 = vrsqrt.f32 %v1338_v63  ;;  %v1339_v45 = vmax.f32 %v1317_v20, 1e-24 }
 0x7d3   :  { %v3239_v43 = vpack.c.bf16 %v1379_v62, %v1378_v61  ;;  %v1369_v2 = vmul.f32 %v2378_v41, %v3125_v18  ;;  %v1327_v25 = vpop.xlane.xlu1 %1326  ;;  %v1384_v36 = vmax.f32 %v1368_v42, 0.0 }
 0x7d4   :  { %v2380_v35 = vpop.eup %2379  ;;  %2389 = vrsqrt.f32 %v1339_v45  ;;  %v1344_v16 = vmax.f32 %v1327_v25, 1e-24 }
 0x7d5   :  { %v1402_v11 = vunpack.c.l.bf16 %v3239_v43  ;;  %v1403_v56 = vunpack.c.h.bf16 %v3239_v43  ;;  %v1385_v39 = vmax.f32 %v1369_v2, 0.0  ;;  %v1366_v3 = vmul.f32 %v2380_v35, %v3123_v17  ;;  %v1329_v48 = vpop.xlane.xlu0 %1328 }
 0x7d6   :  { %v2382_v49 = vpop.eup %2381  ;;  %2391 = vrsqrt.f32 %v1344_v16  ;;  %v1345_v18 = vmax.f32 %v1329_v48, 1e-24  ;;  %v1405_v43 = vunpack.c.h.bf16 %v3237_v5 }
 0x7d7   :  { %v3251_v50 = vpack.c.bf16 %v1385_v39, %v1384_v36  ;;  %v1367_v10 = vmul.f32 %v2382_v49, %v3129_v21  ;;  %v1323_v0 = vpop.xlane.xlu1 %1322  ;;  %v1689_v17 = vmul.f32 %v3169_v51, %v1402_v11  ;;  %v1690_v61 = vmul.f32 %v3194_v57, %v1403_v56 }
 0x7d8   :  { %v2384_v63 = vpop.eup %2383  ;;  %2393 = vrsqrt.f32 %v1345_v18  ;;  %v1342_v46 = vmax.f32 %v1323_v0, 1e-24  ;;  %v1382_v62 = vmax.f32 %v1366_v3, 0.0  ;;  %v3265_v57 = vsel %vm1558_vm1, %v1404_v60, -1e+30 }
 0x7d9   :  { %v1383_v42 = vmax.f32 %v1367_v10, 0.0  ;;  %v1325_v20 = vpop.xlane.xlu0 %1324  ;;  %v1372_v41 = vmul.f32 %v2384_v63, %v3135_v52  ;;  %v1408_v45 = vunpack.c.l.bf16 %v3251_v50  ;;  %v1705_v2 = vadd.f32 %v1690_v61, %v1689_v17 }
 0x7da   :  { %v2386_v21 = vpop.eup %2385  ;;  %2395 = vrsqrt.f32 %v1342_v46  ;;  %v1343_v51 = vmax.f32 %v1325_v20, 1e-24  ;;  %v1691_v39 = vmul.f32 %v3172_v53, %v1404_v60  ;;  %v1692_v23 = vmul.f32 %v3176_v55, %v1405_v43 }
 0x7db   :  { %v1396_v25 = vpack.c.bf16 %v1383_v42, %v1382_v62  ;;  %v1373_v35 = vmul.f32 %v2386_v21, %v3141_v44  ;;  %v3269_v52 = vsel %vm1562_vm3, %v1408_v45, -1e+30  ;;  %v1388_v16 = vmax.f32 %v1372_v41, 0.0 }
 0x7dc   :  { %v2388_v36 = vpop.eup %2387  ;;  %2397 = vrsqrt.f32 %v1343_v51  ;;  %v1590_v5 = vmax.f32 %v3265_v57, %v3269_v52  ;;  %v1706_v18 = vadd.f32 %v1705_v2, %v1691_v39  ;;  %v1572_v10 = vsel %vm1556_vm2, %v1402_v11, -1e+30 }
 0x7dd   :  { %v1406_v3 = vunpack.c.l.bf16 %v1396_v25  ;;  %v1407_v44 = vunpack.c.h.bf16 %v1396_v25  ;;  %v1370_v30 = vmul.f32 %v2388_v36, %v3139_v28  ;;  %v1389_v48 = vmax.f32 %v1373_v35, 0.0 }
 0x7de   :  { %v2390_v49 = vpop.eup %2389  ;;  %v1575_v0 = vsel %vm1559_vm4, %v1405_v43, -1e+30  ;;  %v1409_v53 = vunpack.c.h.bf16 %v3251_v50  ;;  %v1707_v63 = vadd.f32 %v1706_v18, %v1692_v23  ;;  %v1573_v4 = vsel %vm1557_vm6, %v1403_v56, -1e+30 }
 0x7df   :  { %v1693_v28 = vmul.f32 %v3181_v1, %v1406_v3  ;;  %v1371_v60 = vmul.f32 %v2390_v49, %v3145_v34  ;;  %v3287_v17 = vpack.c.bf16 %v1389_v48, %v1388_v16  ;;  %v1576_v12 = vsel %vm1560_vm5, %v1406_v3, -1e+30  ;;  %v1552_v1 = vpop.permute.xlu1 %1551 }
 0x7e0   :  { %v2392_v55 = vpop.eup %2391  ;;  %v1577_v11 = vsel %vm1561_vm7, %v1407_v44, -1e+30  ;;  %v1386_v46 = vmax.f32 %v1370_v30, 0.0  ;;  %v1694_v34 = vmul.f32 %v3184_v58, %v1407_v44  ;;  %v1588_v41 = vmax.f32 %v1572_v10, %v1576_v12 }
 0x7e1   :  { %v1387_v61 = vmax.f32 %v1371_v60, 0.0  ;;  %v1376_v50 = vmul.f32 %v2392_v55, %v3151_v27  ;;  %v1412_v42 = vunpack.c.l.bf16 %v3287_v17  ;;  %v1708_v20 = vadd.f32 %v1707_v63, %v1693_v28  ;;  %v1549_v56 = vpop.permute.xlu0 %1548 }
 0x7e2   :  { %v2394_v62 = vpop.eup %2393  ;;  %v1589_v7 = vmax.f32 %v1573_v4, %v1577_v11  ;;  %v1413_v24 = vunpack.c.h.bf16 %v3287_v17  ;;  %v1579_v43 = vsel %vm1563_vm8, %v1409_v53, -1e+30  ;;  %vm1570_vm13 = vcmp.eq.s32.totalorder %v1552_v1, 1 }
 0x7e3   :  { %v1398_v21 = vpack.c.bf16 %v1387_v61, %v1386_v46  ;;  %v1377_v13 = vmul.f32 %v2394_v62, %v3157_v38  ;;  %v1392_v27 = vmax.f32 %v1376_v50, 0.0  ;;  %v1695_v58 = vmul.f32 %v3186_v15, %v1408_v45 }
 0x7e4   :  { %v2396_v51 = vpop.eup %2395  ;;  %v1709_v2 = vadd.f32 %v1708_v20, %v1694_v34  ;;  %v1582_v38 = vsel %vm1566_vm9, %v1412_v42, -1e+30  ;;  %v1696_v3 = vmul.f32 %v3188_v8, %v1409_v53  ;;  %v1591_v59 = vmax.f32 %v1575_v0, %v1579_v43 }
 0x7e5   :  { %v1410_v25 = vunpack.c.l.bf16 %v1398_v21  ;;  %v1411_v35 = vunpack.c.h.bf16 %v1398_v21  ;;  %v1374_v36 = vmul.f32 %v2396_v51, %v3155_v33  ;;  %v1393_v16 = vmax.f32 %v1377_v13, 0.0  ;;  %v1555_v18 = vpop.permute.xlu0 %1554 }
 0x7e6   :  { %v2398_v39 = vpop.eup %2397  ;;  %v1710_v44 = vadd.f32 %v1709_v2, %v1695_v58  ;;  %v1583_v15 = vsel %vm1567_vm10, %v1413_v24, -1e+30  ;;  %vm1571_vm14 = vcmp.eq.s32.totalorder %v1555_v18, 1  ;;  %v1699_v55 = vmul.f32 %v3198_v6, %v1412_v42 }
 0x7e7   :  { %v1375_v30 = vmul.f32 %v2398_v39, %v3161_v40  ;;  %v1401_v48 = vpack.c.bf16 %v1393_v16, %v1392_v27  ;;  %v1697_v49 = vmul.f32 %v3190_v22, %v1410_v25  ;;  %v1390_v45 = vmax.f32 %v1374_v36, 0.0 }
 0x7e8   :  { %v1711_v23 = vadd.f32 %v1710_v44, %v1696_v3  ;;  %v1580_v33 = vsel %vm1564_vm12, %v1410_v25, -1e+30  ;;  %v1581_v31 = vsel %vm1565_vm11, %v1411_v35, -1e+30  ;;  %v1594_v40 = vmax.f32 %v1590_v5, %v1582_v38  ;;  %v1761_v44 = vld [vmem:[%s3351_s10] sm:$0x1] }
 0x7e9   :  { %v1391_v8 = vmax.f32 %v1375_v30, 0.0  ;;  %v1416_v10 = vunpack.c.l.bf16 %v1401_v48  ;;  %v1417_v0 = vunpack.c.h.bf16 %v1401_v48  ;;  %v1592_v53 = vmax.f32 %v1588_v41, %v1580_v33 }
 0x7ea   :  { %v1698_v22 = vmul.f32 %v3192_v37, %v1411_v35  ;;  %v1712_v29 = vadd.f32 %v1711_v23, %v1697_v49  ;;  %v1593_v28 = vmax.f32 %v1589_v7, %v1581_v31  ;;  %v1595_v17 = vmax.f32 %v1591_v59, %v1583_v15 }
 0x7eb   :  { %v1586_v60 = vsel %vm1570_vm13, %v1416_v10, -1e+30  ;;  %v1400_v26 = vpack.c.bf16 %v1391_v8, %v1390_v45  ;;  %v1587_v4 = vsel %vm1571_vm14, %v1417_v0, -1e+30  ;;  %v1700_v37 = vmul.f32 %v3196_v14, %v1413_v24  ;;  %v1687_v14 = vpop.permute.xlu1 %1686 }
 0x7ec   :  { %v1598_v32 = vmax.f32 %v1594_v40, %v1586_v60  ;;  %v1713_v63 = vadd.f32 %v1712_v29, %v1698_v22  ;;  %v1599_v46 = vmax.f32 %v1595_v17, %v1587_v4  ;;  %vm1569_vm0 = vcmp.eq.s32.totalorder %v1549_v56, 1 }
 0x7ed   :  { %v1414_v12 = vunpack.c.l.bf16 %v1400_v26  ;;  %v1415_v11 = vunpack.c.h.bf16 %v1400_v26  ;;  %v1703_v41 = vmul.f32 %v3230_v47, %v1416_v10  ;;  %v1704_v56 = vmul.f32 %v1687_v14, %v1417_v0 }
 0x7ee   :  { %v1714_v57 = vadd.f32 %v1713_v63, %v1699_v55  ;;  %v1601_v62 = vmax.f32 %v1598_v32, %v1599_v46  ;;  %v1726_v13 = vstv %s1475_s17 }
 0x7ef   :  { %v1701_v52 = vmul.f32 %v3202_v9, %v1414_v12  ;;  %v1584_v5 = vsel %vm1568_vm15, %v1414_v12, -1e+30  ;;  %v1585_v61 = vsel %vm1569_vm0, %v1415_v11, -1e+30  ;;  %v1702_v6 = vmul.f32 %v3216_v19, %v1415_v11 }
 0x7f0   :  { %v1715_v50 = vadd.f32 %v1714_v57, %v1700_v37  ;;  %v1596_v1 = vmax.f32 %v1592_v53, %v1584_v5  ;;  %v1597_v34 = vmax.f32 %v1593_v28, %v1585_v61  ;;  %2399 = vrcp.f32 %v1726_v13 }
 0x7f2   :  { %v1716_v42 = vadd.f32 %v1715_v50, %v1701_v52  ;;  %v1600_v20 = vmax.f32 %v1596_v1, %v1597_v34 }
 0x7f4   :  { %v1717_v54 = vadd.f32 %v1716_v42, %v1702_v6  ;;  %v1602_v7 = vmax.f32 %v1600_v20, %v1601_v62 }
 0x7f6   :  { %v1718_v9 = vadd.f32 %v1717_v54, %v1703_v41  ;;  %v1603_v21 = vrot.slane %v1602_v7, 4 }
 0x7f8   :  { %v1719_v24 = vadd.f32 %v1718_v9, %v1704_v56  ;;  %v1604_v43 = vmax.f32 %v1602_v7, %v1603_v21 }
 0x7fa   :  { %v1720_v51 = vrot.slane %v1719_v24, 4  ;;  %v1605_v27 = vrot.slane %v1604_v43, 2  ;;  %v2400_v16 = vpop.eup %2399 }
 0x7fc   :  { %v1721_v58 = vadd.f32 %v1720_v51, %v1719_v24  ;;  %v1606_v2 = vmax.f32 %v1604_v43, %v1605_v27 }
 0x7fe   :  { %v1722_v19 = vrot.slane %v1721_v58, 2  ;;  %v1607_v47 = vrot.slane %v1606_v2, 1 }
 0x800   :  { %v1723_v25 = vadd.f32 %v1722_v19, %v1721_v58  ;;  %v1608_v38 = vmax.f32 %v1606_v2, %v1607_v47 }
 0x802   :  { %v1724_v35 = vrot.slane %v1723_v25, 1 }
 0x804   :  { %v1725_v36 = vadd.f32 %v1724_v35, %v1723_v25 }
 0x806   :  { %v1728_v39 = vmul.f32 %v2400_v16, %v1725_v36 }
 0x808   :  { %1826 = vmatprep.mubr.f32.mxu0 %v1728_v39 }
 0x809   :  { %1827 = vmatmul.mubr.f32.vlgmr.msra.gmra.mrb[48].mxu0 %v1608_v38 }
 0x8dc   :  { %v2021_v3 = vpop.f32.mrb[48].mxu0 }
 0x8dd   :  { %v2022_v59 = vpop.f32.mrb[49].mxu0 }
 0x8de   :  { %v2023_v30 = vadd.f32 %v2022_v59, %v2021_v3 }
 0x8e0   :  { %v1829_v48 = vadd.f32 %v2023_v30, %v1761_v44 }
 0x8e2   :  { %1832 = vst [vmem:[#allocation10] sm:$0x1] %v1829_v48 }
 0x8e3   :  { %2507 = shalt.err (!%p2504_p8)
}
 0x8e4   :  { %s2508_s4 = scalar_lea.hbm %s3352_s11, 16 }
 0x8e5   :  { %p2509_p9 = scmp.ne.s32.totalorder %s3352_s11, %s2508_s4  ;;  %p2512_p10 = scmp.lt.u32.totalorder %s2508_s4, %s3352_s11 }
 0x8e7   :  { %p2514_p11 = pnand %p2512_p10, %p2509_p9 }
 0x8e9   :  { %2517 = shalt.err (!%p2514_p11)
}
 0x8ea   :  { %1842 = dma.vmem_to_hbm [thread:$0]  %s1840_s19, 16, %s3352_s11, [#allocation4]  }
 0x8eb   :  { %2524 = dma.done.wait [#allocation4], 16  }
 0x8ec   :  { %2525 = vsyncadd [#allocation4], 4294967280 }
 0x8ed   :  { %1846 = vsyncpa [#allocation3], 1 }
 0x8ee   :  { %1847 = vsyncpa [#allocation6], 1 }
 0x8ef   :  { %1848 = vsyncpa [#allocation9], 1 }
 0x8f0   :  { %1849 = vsyncpa [#allocation4], 1 }

</bundles_post_ra>
